<compile_context>
chip_gen: v6e
topology: v6e:2x2x1
jax: 0.10.0
libtpu: 0.0.40
codegen_flags: <defaults>
</compile_context>

<pallas_src>
import numpy as np
import jax
import jax.numpy as jnp
from jax.experimental import pallas as pl
from jax.experimental.pallas import tpu as pltpu


# ----------------------------------------------------------------------------
# config (small, deterministic shapes consistent with the module)
# ----------------------------------------------------------------------------
CFG = dict(
    n_src_vocab=50,
    len_max_seq=16,     # n_position for the sinusoid table
    d_word_vec=8,       # == d_model (the reference code implicitly requires this)
    n_layers=2,
    n_head=4,
    d_k=8,              # head_dim
    d_v=8,
    d_model=8,
    d_inner=32,
    n_hidden=32,
    n_out=16,
    MASK=0,
    EMPTY_OPRA=1,
)
B, L = 2, 8                          # batch, (padded) sequence length
H = 3 * CFG["d_word_vec"]            # hidden_size = 3 * d_model            (24)
D = CFG["n_head"] * CFG["d_k"]       # nhead * head_dim                     (32)
DH = CFG["d_k"]                      # head_dim                             (8)
NHEAD = CFG["n_head"]                # heads                                (4)
DI = CFG["d_inner"]                  # ffn inner dim                        (32)
NH, NO = CFG["n_hidden"], CFG["n_out"]
ITERS = CFG["n_layers"]
BL = B * L

# slab geometry ---------------------------------------------------------------
LANE = 128
LROWS = 32            # rows per layer block in the weight slab (>= max(H, DI, D))
VSLOT = 6             # lane slot (x128) holding the per-layer bias / LN vectors
MASK_LANE = 32        # lane of the mask column in the activation slab (32-aligned)
ACT_W = max(H, BL, MASK_LANE + 1)


def _r8(x):
    return (x + 7) // 8 * 8


# static-constants / head-weights slab: row layout (all offsets multiples of 8)
_S = {}
_row = 0
for _name, _rows in [("ET", B), ("SEG", D), ("SEGT", NHEAD), ("MCOMB", 3 * BL),
                     ("HW1", 2 * H), ("HW2", 3 * NH), ("HB", 2)]:
    _S[_name] = _row
    _row = _r8(_row + _rows)
S_ROWS = _row


# ----------------------------------------------------------------------------
# in-kernel helpers
# ----------------------------------------------------------------------------
def _mm(a, b):
    return jnp.dot(a, b, preferred_element_type=jnp.float32)


def _layer_norm(x, g, b, eps=1e-5):
    mu = jnp.mean(x, axis=-1, keepdims=True)
    xc = x - mu
    var = jnp.mean(xc * xc, axis=-1, keepdims=True)
    return xc * jax.lax.rsqrt(var + eps) * g + b


def _leaky_relu(x, slope=0.01):
    return jnp.where(x >= 0, x, slope * x)


def _expand_rows(x):
    """(B, W) -> (B*L, W): per-batch sublane broadcast (aligned concat, no MXU)."""
    return jnp.concatenate(
        [jnp.broadcast_to(x[b:b + 1, :], (L, x.shape[1])) for b in range(B)], axis=0)


# ----------------------------------------------------------------------------
# fused kernel: encoder (pwff -> ring attention -> LN+leaky -> star attention
# -> mask fill, repeated ITERS times)  +  position gather  +  3 MLP heads.
# Inputs: 3 slabs (activations, per-layer weights, static constants + heads).
# ----------------------------------------------------------------------------
def model_kernel(act_ref, wl_ref, ws_ref, out_ref):
    # ---------------- static constants / head weights (one slab) ------------
    ET = ws_ref[_S["ET"]:_S["ET"] + B, 0:BL]                # (B, BL)  sum over L
    seg = ws_ref[_S["SEG"]:_S["SEG"] + D, 0:NHEAD]          # (D, nhead) * 1/sqrt(dh)
    segT = ws_ref[_S["SEGT"]:_S["SEGT"] + NHEAD, 0:D]       # (nhead, D)
    mcomb = ws_ref[_S["MCOMB"]:_S["MCOMB"] + 3 * BL, 0:BL + B]  # fused shift/bcast
    hw1 = ws_ref[_S["HW1"]:_S["HW1"] + 2 * H, 0:3 * NH]
    hw2 = ws_ref[_S["HW2"]:_S["HW2"] + 3 * NH, 0:3 * NO]
    hb1 = ws_ref[_S["HB"]:_S["HB"] + 1, 0:3 * NH]
    hb2 = ws_ref[_S["HB"] + 1:_S["HB"] + 2, 0:3 * NO]

    # ---------------- activations slab --------------------------------------
    nodes = act_ref[0:BL, 0:H]                              # (BL, H) emb + pos enc
    mask = act_ref[0:BL, MASK_LANE:MASK_LANE + 1]           # (BL, 1) 1.0 @ MASK tok
    gather = act_ref[BL:BL + B, 0:BL]                       # (B, BL) pos one-hot

    keep = 1.0 - mask                                       # hoisted (loop invariant)
    sbias = mask * (-1e30)                                  # star key bias
    relay = _mm(ET, nodes) * (1.0 / L)                      # mean over L (incl. pad)

    for i in range(ITERS):
        r0 = i * LROWS

        def WM(slot, rows, cols):                           # per-layer matrix
            return wl_ref[r0:r0 + rows, slot * LANE:slot * LANE + cols]

        def WV(row, cols):                                  # per-layer vector (1, cols)
            return wl_ref[r0 + row:r0 + row + 1, VSLOT * LANE:VSLOT * LANE + cols]

        # ---------------- PositionwiseFeedForward (norm_func) ----------------
        h1 = jnp.maximum(_mm(nodes, WM(0, H, DI)) + WV(0, DI), 0.0)
        h2 = _mm(h1, WM(1, DI, H)) + WV(1, H)
        pw = _layer_norm(h2 + nodes, WV(2, H), WV(3, H))                # (BL, H)

        # ---------------- ring attention (_MSA1) -----------------------------
        # one QKV matmul for nodes AND relay (row-concat)
        qkv = _mm(jnp.concatenate([pw, relay], axis=0), WM(2, H, 3 * D)) + WV(6, 3 * D)
        q = qkv[0:BL, 0:D]
        kv = qkv[0:BL, D:3 * D]                                          # node [k|v]
        # fused {prev-shift, next-shift, relay-broadcast} of [k|v] in ONE matmul;
        # zero rows of MCOMB reproduce F.unfold's zero padding exactly.
        comb = _mm(mcomb, qkv[:, D:3 * D])                               # (3BL, 2D)
        kvp, kvn, akv = comb[0:BL], comb[BL:2 * BL], comb[2 * BL:3 * BL]

        # scores for [prev | self | next | relay], one matmul (sublane-stacked)
        erow = jnp.concatenate(
            [q * kvp[:, 0:D], q * kv[:, 0:D], q * kvn[:, 0:D], q * akv[:, 0:D]], axis=0)
        vrow = jnp.concatenate(
            [kvp[:, D:2 * D], kv[:, D:2 * D], kvn[:, D:2 * D], akv[:, D:2 * D]], axis=0)
        srow = _mm(erow, seg)                                            # (4BL, nhead)
        m4 = jnp.maximum(jnp.maximum(srow[0:BL], srow[BL:2 * BL]),
                         jnp.maximum(srow[2 * BL:3 * BL], srow[3 * BL:4 * BL]))
        prow = jnp.exp(srow - jnp.concatenate([m4, m4, m4, m4], axis=0))
        den = (prow[0:BL] + prow[BL:2 * BL] + prow[2 * BL:3 * BL] + prow[3 * BL:4 * BL])
        inv = pl.reciprocal(den, approx=False)
        pn = prow * jnp.concatenate([inv, inv, inv, inv], axis=0)
        pv = _mm(pn, segT) * vrow                                        # (4BL, D)
        att = pv[0:BL] + pv[BL:2 * BL] + pv[2 * BL:3 * BL] + pv[3 * BL:4 * BL]
        ring = _mm(att, WM(3, D, H)) + WV(7, H)                          # (BL, H)
        nodes_new = _leaky_relu(_layer_norm(ring, WV(4, H), WV(5, H)))

        # ---------------- star attention (_MSA2): relay over [relay; nodes] --
        skv = _mm(jnp.concatenate([nodes_new, relay], axis=0), WM(4, H, 3 * D)) + WV(8, 3 * D)
        qr = skv[BL:BL + B, 0:D]                                         # (B, D)
        kN = skv[0:BL, D:2 * D]
        vN = skv[0:BL, 2 * D:3 * D]
        kR = skv[BL:BL + B, D:2 * D]
        vR = skv[BL:BL + B, 2 * D:3 * D]

        srows = jnp.concatenate([_expand_rows(qr) * kN, qr * kR], axis=0)  # (BL+B, D)
        s_all = _mm(srows, seg)                                            # (BL+B, nhead)
        sN = s_all[0:BL] + sbias                                           # masked nodes
        sR = s_all[BL:BL + B]                                              # relay key
        ms = jnp.maximum(
            jnp.concatenate([jnp.max(sN[b * L:(b + 1) * L], axis=0, keepdims=True)
                             for b in range(B)], axis=0), sR)              # (B, nhead)
        pN = jnp.exp(sN - _expand_rows(ms))
        pR = jnp.exp(sR - ms)
        pb = _mm(jnp.concatenate([pN, pR], axis=0), segT)                  # (BL+B, D)
        sums = _mm(ET, jnp.concatenate([pb[0:BL] * vN, pN], axis=1))       # (B, D+nhead)
        attN = sums[:, 0:D]                                                # unnormalized
        den2 = sums[:, D:D + NHEAD] + pR                                   # (B, nhead)
        invD = pl.reciprocal(_mm(den2, segT), approx=False)                # (B, D)
        attR = (attN + pb[BL:BL + B] * vR) * invD                          # (B, D)
        relay = _leaky_relu(_mm(attR, WM(5, D, H)) + WV(9, H))             # (B, H)

        # ---------------- masked_fill_(ex_mask, 0) ----------------------------
        nodes = nodes_new * keep

    # ------- target gather (one-hot matmul) + fused 3-head MLP ----------------
    target = _mm(gather, nodes)                                            # (B, H)
    ft = jnp.concatenate([relay, target], axis=1)                          # (B, 2H)
    hh = jnp.maximum(_mm(ft, hw1) + hb1, 0.0)                              # (B, 3*NH)
    out_ref[...] = _mm(hh, hw2) + hb2                                      # (B, 3*NO)


# ----------------------------------------------------------------------------
# parameter init (deterministic, synthetic, reference-shaped)
# ----------------------------------------------------------------------------
def get_sinusoid_encoding_table(n_position, d_hid, padding_idx=None):
    pos = np.arange(n_position)[:, None].astype(np.float64)
    hid = np.arange(d_hid)[None, :]
    angle = pos / np.power(10000, 2 * (hid // 2) / d_hid)
    table = np.zeros((n_position, d_hid), dtype=np.float32)
    table[:, 0::2] = np.sin(angle[:, 0::2])
    table[:, 1::2] = np.cos(angle[:, 1::2])
    if padding_idx is not None:
        table[padding_idx] = 0.0
    return jnp.asarray(table)


def init_params(key):
    it = ITERS
    keys = iter(jax.random.split(key, 64))

    def rnd(shape, scale=0.1):
        return (scale * jax.random.normal(next(keys), shape)).astype(jnp.float32)

    P = {}
    P["emb"] = rnd((CFG["n_src_vocab"], CFG["d_word_vec"]))
    P["pos_table"] = get_sinusoid_encoding_table(CFG["len_max_seq"], H, padding_idx=0)

    P["ln_g"] = jnp.ones((it, H), jnp.float32)
    P["ln_b"] = jnp.zeros((it, H), jnp.float32)
    P["pw_w1"] = rnd((it, H, DI));  P["pw_b1"] = rnd((it, DI))
    P["pw_w2"] = rnd((it, DI, H));  P["pw_b2"] = rnd((it, H))
    P["pw_g"] = jnp.ones((it, H), jnp.float32)
    P["pw_bt"] = jnp.zeros((it, H), jnp.float32)
    for n in ("rq", "rk", "rv", "sq", "sk", "sv"):
        P[f"{n}_w"] = rnd((it, H, D))
        P[f"{n}_b"] = rnd((it, D))
    for n in ("ro", "so"):
        P[f"{n}_w"] = rnd((it, D, H))
        P[f"{n}_b"] = rnd((it, H))
    P["head_w1"] = rnd((3, 2 * H, NH))
    P["head_b1"] = rnd((3, NH))
    P["head_w2"] = rnd((3, NH, NO))
    P["head_b2"] = rnd((3, NO))
    return P


def pack_params(P):
    """Repack the reference-shaped parameters into the 2 weight slabs and build
    the shape-only constant matrices the kernel uses (all offsets static)."""
    npf = np.float32

    # fused Q/K/V projections
    rqkv_w = np.concatenate([np.asarray(P["rq_w"]), np.asarray(P["rk_w"]),
                             np.asarray(P["rv_w"])], axis=-1)
    rqkv_b = np.concatenate([np.asarray(P["rq_b"]), np.asarray(P["rk_b"]),
                             np.asarray(P["rv_b"])], axis=-1)
    sqkv_w = np.concatenate([np.asarray(P["sq_w"]), np.asarray(P["sk_w"]),
                             np.asarray(P["sv_w"])], axis=-1)
    sqkv_b = np.concatenate([np.asarray(P["sq_b"]), np.asarray(P["sk_b"]),
                             np.asarray(P["sv_b"])], axis=-1)

    # ---------------- per-layer weight slab: (ITERS*32, 7*128) ----------------
    wl = np.zeros((ITERS * LROWS, 7 * LANE), npf)

    def putm(i, slot, W):
        W = np.asarray(W, npf)
        r, c = W.shape
        wl[i * LROWS:i * LROWS + r, slot * LANE:slot * LANE + c] = W

    def putv(i, row, v):
        v = np.asarray(v, npf).reshape(-1)
        wl[i * LROWS + row, VSLOT * LANE:VSLOT * LANE + v.shape[0]] = v

    for i in range(ITERS):
        putm(i, 0, P["pw_w1"][i]); putm(i, 1, P["pw_w2"][i])
        putm(i, 2, rqkv_w[i]);     putm(i, 3, P["ro_w"][i])
        putm(i, 4, sqkv_w[i]);     putm(i, 5, P["so_w"][i])
        putv(i, 0, P["pw_b1"][i]); putv(i, 1, P["pw_b2"][i])
        putv(i, 2, P["pw_g"][i]);  putv(i, 3, P["pw_bt"][i])
        putv(i, 4, P["ln_g"][i]);  putv(i, 5, P["ln_b"][i])
        putv(i, 6, rqkv_b[i]);     putv(i, 7, P["ro_b"][i])
        putv(i, 8, sqkv_b[i]);     putv(i, 9, P["so_b"][i])

    # --------- static constants + head weights slab: (S_ROWS, 128) -----------
    st = np.zeros((S_ROWS, LANE), npf)

    def put(name, W, row_off=0):
        W = np.asarray(W, npf)
        r, c = W.shape
        st[_S[name] + row_off:_S[name] + row_off + r, 0:c] = W

    ETm = np.zeros((B, BL), npf)
    for b in range(B):
        ETm[b, b * L:(b + 1) * L] = 1.0
    put("ET", ETm)

    segm = np.zeros((D, NHEAD), npf)
    segTm = np.zeros((NHEAD, D), npf)
    for h in range(NHEAD):
        segm[h * DH:(h + 1) * DH, h] = 1.0 / np.sqrt(DH)
        segTm[h, h * DH:(h + 1) * DH] = 1.0
    put("SEG", segm)
    put("SEGT", segTm)

    # fused [prev-shift ; next-shift ; relay-broadcast] operating on [node_kv;relay_kv]
    mc = np.zeros((3 * BL, BL + B), npf)
    for b in range(B):
        for p in range(L):
            r = b * L + p
            if p >= 1:
                mc[r, r - 1] = 1.0                 # zero row at p == 0
            if p <= L - 2:
                mc[BL + r, r + 1] = 1.0            # zero row at p == L-1
            mc[2 * BL + r, BL + b] = 1.0           # relay broadcast to every position
    put("MCOMB", mc)

    put("HW1", np.concatenate([np.asarray(P["head_w1"][j]) for j in range(3)], axis=1))
    w2 = np.zeros((3 * NH, 3 * NO), npf)
    for j in range(3):
        w2[j * NH:(j + 1) * NH, j * NO:(j + 1) * NO] = np.asarray(P["head_w2"][j])
    put("HW2", w2)
    put("HB", np.concatenate([np.asarray(P["head_b1"][j]) for j in range(3)])[None, :], 0)
    put("HB", np.concatenate([np.asarray(P["head_b2"][j]) for j in range(3)])[None, :], 1)

    return {
        "emb": P["emb"],
        "pos_table": P["pos_table"],
        "wlayers": jnp.asarray(wl),
        "wstatic": jnp.asarray(st),
    }


# ----------------------------------------------------------------------------
# full forward: embedding lookup + positional encoding + mask + gather one-hot
# packed into one activation slab in XLA; everything else in ONE Pallas kernel
# ----------------------------------------------------------------------------
# TODO(synk): the reference `pad()` uses keras pad_sequences on a ragged python
# list (host-side data prep); here the input is accepted already padded to
# (B, L, 3) with the [MASK, EMPTY_OPRA, EMPTY_OPRA] pad triple.
def forward(src_seq, positions, Q):
    Bc, Lc, _ = src_seq.shape

    # embedding lookup of the 3 token fields, concatenated -> hidden_size H
    emb = Q["emb"][src_seq]                                    # (B, L, 3, d_word_vec)
    embs = (emb.reshape(Bc, Lc, H) + Q["pos_table"][:Lc][None, :, :]).astype(jnp.float32)
    mask_col = (src_seq[:, :, 0] == CFG["MASK"]).astype(jnp.float32).reshape(Bc * Lc, 1)

    # activation slab: rows 0:BL -> [embs | mask], rows BL:BL+B -> gather one-hot
    node_rows = jnp.zeros((Bc * Lc, ACT_W), jnp.float32)
    node_rows = node_rows.at[:, 0:H].set(embs.reshape(Bc * Lc, H))
    node_rows = node_rows.at[:, MASK_LANE:MASK_LANE + 1].set(mask_col)
    flat_pos = positions.astype(jnp.int32) + jnp.arange(Bc, dtype=jnp.int32) * Lc
    onehot = jax.nn.one_hot(flat_pos, Bc * Lc, dtype=jnp.float32)   # (B, BL)
    gather_rows = jnp.zeros((Bc, ACT_W), jnp.float32).at[:, 0:Bc * Lc].set(onehot)
    act = jnp.concatenate([node_rows, gather_rows], axis=0)         # (BL+B, ACT_W)

    vmem = pl.BlockSpec(memory_space=pltpu.MemorySpace.VMEM)
    out = pl.pallas_call(
        model_kernel,
        out_shape=jax.ShapeDtypeStruct((Bc, 3 * NO), jnp.float32),
        in_specs=[vmem, vmem, vmem],
        out_specs=vmem,
    )(act, Q["wlayers"], Q["wstatic"])

    # torch.cat([op, opr1, opr2], dim=1).view(3*m, n) == row-major reshape
    return out.reshape(3 * Bc, NO)


# ----------------------------------------------------------------------------
if __name__ == "__main__":
    key = jax.random.PRNGKey(0)
    k_param, k_seq = jax.random.split(key)

    P = init_params(k_param)
    Q = pack_params(P)

    # integer instruction triples [opcode, oprand1, oprand2]; last 2 positions
    # are padding: [MASK, EMPTY_OPRA, EMPTY_OPRA]
    src_seq = jax.random.randint(k_seq, (B, L, 3), 2, CFG["n_src_vocab"],
                                 dtype=jnp.int32)
    pad_triple = jnp.array([CFG["MASK"], CFG["EMPTY_OPRA"], CFG["EMPTY_OPRA"]],
                           dtype=jnp.int32)
    src_seq = src_seq.at[:, L - 2:, :].set(pad_triple)
    positions = jnp.array([2, 4], dtype=jnp.int32)

    out = jax.jit(forward)(src_seq, positions, Q)
    out = jax.block_until_ready(out)

    assert out.shape == (3 * B, NO)
    assert bool(jnp.all(jnp.isfinite(out)))
    print("KERNEL_OK")
</pallas_src>

<mosaic_0001>
module attributes {stable_mosaic.version = 11 : i64} {
  func.func @model_kernel(%arg0: memref<18x33xf32, #tpu.memory_space<vmem>>, %arg1: memref<64x896xf32, #tpu.memory_space<vmem>>, %arg2: memref<248x128xf32, #tpu.memory_space<vmem>>, %arg3: memref<2x48xf32, #tpu.memory_space<vmem>>) attributes {dimension_semantics = [], scalar_prefetch = 0 : i64, scratch_operands = 0 : i64, tpu.core_type = #tpu.core_type<tc>} {
    %c0 = arith.constant 0 : index
    %c0_0 = arith.constant 0 : index
    %0 = vector.load %arg2[%c0, %c0_0] : memref<248x128xf32, #tpu.memory_space<vmem>>, vector<2x16xf32>
    %c8 = arith.constant 8 : index
    %c0_1 = arith.constant 0 : index
    %1 = vector.load %arg2[%c8, %c0_1] : memref<248x128xf32, #tpu.memory_space<vmem>>, vector<32x4xf32>
    %c40 = arith.constant 40 : index
    %c0_2 = arith.constant 0 : index
    %2 = vector.load %arg2[%c40, %c0_2] : memref<248x128xf32, #tpu.memory_space<vmem>>, vector<4x32xf32>
    %c48 = arith.constant 48 : index
    %c0_3 = arith.constant 0 : index
    %3 = vector.load %arg2[%c48, %c0_3] : memref<248x128xf32, #tpu.memory_space<vmem>>, vector<48x18xf32>
    %c96 = arith.constant 96 : index
    %c0_4 = arith.constant 0 : index
    %4 = vector.load %arg2[%c96, %c0_4] : memref<248x128xf32, #tpu.memory_space<vmem>>, vector<48x96xf32>
    %c144 = arith.constant 144 : index
    %c0_5 = arith.constant 0 : index
    %5 = vector.load %arg2[%c144, %c0_5] : memref<248x128xf32, #tpu.memory_space<vmem>>, vector<96x48xf32>
    %c240 = arith.constant 240 : index
    %c0_6 = arith.constant 0 : index
    %6 = vector.load %arg2[%c240, %c0_6] : memref<248x128xf32, #tpu.memory_space<vmem>>, vector<1x96xf32>
    %c241 = arith.constant 241 : index
    %c0_7 = arith.constant 0 : index
    %7 = vector.load %arg2[%c241, %c0_7] : memref<248x128xf32, #tpu.memory_space<vmem>>, vector<1x48xf32>
    %c0_8 = arith.constant 0 : index
    %c0_9 = arith.constant 0 : index
    %8 = vector.load %arg0[%c0_8, %c0_9] : memref<18x33xf32, #tpu.memory_space<vmem>>, vector<16x24xf32>
    %c0_10 = arith.constant 0 : index
    %c32 = arith.constant 32 : index
    %9 = vector.load %arg0[%c0_10, %c32] : memref<18x33xf32, #tpu.memory_space<vmem>>, vector<16x1xf32>
    %c16 = arith.constant 16 : index
    %c0_11 = arith.constant 0 : index
    %10 = vector.load %arg0[%c16, %c0_11] : memref<18x33xf32, #tpu.memory_space<vmem>>, vector<2x16xf32>
    %cst = arith.constant 1.000000e+00 : f32
    %11 = vector.broadcast %cst : f32 to vector<16x1xf32>
    %12 = arith.subf %11, %9 : vector<16x1xf32>
    %cst_12 = arith.constant -1.000000e+30 : f32
    %13 = vector.broadcast %cst_12 : f32 to vector<16x1xf32>
    %14 = arith.mulf %9, %13 : vector<16x1xf32>
    %cst_13 = arith.constant dense<0.000000e+00> : vector<2x24xf32>
    %15 = tpu.matmul %0, %8, %cst_13 {dimension_numbers = #tpu.dot_dimension_numbers<[1], [0], [0], [1], [0, 0, 1, 1], [], []>} : vector<2x16xf32>, vector<16x24xf32>, vector<2x24xf32> -> vector<2x24xf32>
    %cst_14 = arith.constant 1.250000e-01 : f32
    %16 = vector.broadcast %cst_14 : f32 to vector<2x24xf32>
    %17 = arith.mulf %15, %16 : vector<2x24xf32>
    %c0_15 = arith.constant 0 : index
    %c0_16 = arith.constant 0 : index
    %18 = vector.load %arg1[%c0_15, %c0_16] : memref<64x896xf32, #tpu.memory_space<vmem>>, vector<24x32xf32>
    %cst_17 = arith.constant dense<0.000000e+00> : vector<16x32xf32>
    %19 = tpu.matmul %8, %18, %cst_17 {dimension_numbers = #tpu.dot_dimension_numbers<[1], [0], [0], [1], [0, 0, 1, 1], [], []>} : vector<16x24xf32>, vector<24x32xf32>, vector<16x32xf32> -> vector<16x32xf32>
    %c0_18 = arith.constant 0 : index
    %c768 = arith.constant 768 : index
    %20 = vector.load %arg1[%c0_18, %c768] : memref<64x896xf32, #tpu.memory_space<vmem>>, vector<1x32xf32>
    %21 = vector.broadcast %20 : vector<1x32xf32> to vector<16x32xf32>
    %22 = arith.addf %19, %21 : vector<16x32xf32>
    %cst_19 = arith.constant 0.000000e+00 : f32
    %23 = vector.broadcast %cst_19 : f32 to vector<16x32xf32>
    %24 = arith.maximumf %22, %23 : vector<16x32xf32>
    %c0_20 = arith.constant 0 : index
    %c128 = arith.constant 128 : index
    %25 = vector.load %arg1[%c0_20, %c128] : memref<64x896xf32, #tpu.memory_space<vmem>>, vector<32x24xf32>
    %cst_21 = arith.constant dense<0.000000e+00> : vector<16x24xf32>
    %26 = tpu.matmul %24, %25, %cst_21 {dimension_numbers = #tpu.dot_dimension_numbers<[1], [0], [0], [1], [0, 0, 1, 1], [], []>} : vector<16x32xf32>, vector<32x24xf32>, vector<16x24xf32> -> vector<16x24xf32>
    %c1 = arith.constant 1 : index
    %c768_22 = arith.constant 768 : index
    %27 = vector.load %arg1[%c1, %c768_22] : memref<64x896xf32, #tpu.memory_space<vmem>>, vector<1x24xf32>
    %28 = vector.broadcast %27 : vector<1x24xf32> to vector<16x24xf32>
    %29 = arith.addf %26, %28 : vector<16x24xf32>
    %30 = arith.addf %29, %8 : vector<16x24xf32>
    %c2 = arith.constant 2 : index
    %c768_23 = arith.constant 768 : index
    %31 = vector.load %arg1[%c2, %c768_23] : memref<64x896xf32, #tpu.memory_space<vmem>>, vector<1x24xf32>
    %c3 = arith.constant 3 : index
    %c768_24 = arith.constant 768 : index
    %32 = vector.load %arg1[%c3, %c768_24] : memref<64x896xf32, #tpu.memory_space<vmem>>, vector<1x24xf32>
    %cst_25 = arith.constant dense<0.000000e+00> : vector<16xf32>
    %33 = vector.multi_reduction <add>, %30, %cst_25 [1] : vector<16x24xf32> to vector<16xf32>
    %34 = vector.shape_cast %33 : vector<16xf32> to vector<16x1xf32>
    %cst_26 = arith.constant 2.400000e+01 : f32
    %35 = vector.broadcast %cst_26 : f32 to vector<16x1xf32>
    %36 = arith.divf %34, %35 : vector<16x1xf32>
    %37 = vector.broadcast %36 : vector<16x1xf32> to vector<16x24xf32>
    %38 = arith.subf %30, %37 : vector<16x24xf32>
    %39 = arith.mulf %38, %38 : vector<16x24xf32>
    %cst_27 = arith.constant dense<0.000000e+00> : vector<16xf32>
    %40 = vector.multi_reduction <add>, %39, %cst_27 [1] : vector<16x24xf32> to vector<16xf32>
    %41 = vector.shape_cast %40 : vector<16xf32> to vector<16x1xf32>
    %cst_28 = arith.constant 2.400000e+01 : f32
    %42 = vector.broadcast %cst_28 : f32 to vector<16x1xf32>
    %43 = arith.divf %41, %42 : vector<16x1xf32>
    %cst_29 = arith.constant 9.99999974E-6 : f32
    %44 = vector.broadcast %cst_29 : f32 to vector<16x1xf32>
    %45 = arith.addf %43, %44 : vector<16x1xf32>
    %46 = math.rsqrt %45 : vector<16x1xf32>
    %47 = vector.broadcast %46 : vector<16x1xf32> to vector<16x24xf32>
    %48 = arith.mulf %38, %47 : vector<16x24xf32>
    %49 = vector.broadcast %31 : vector<1x24xf32> to vector<16x24xf32>
    %50 = arith.mulf %48, %49 : vector<16x24xf32>
    %51 = vector.broadcast %32 : vector<1x24xf32> to vector<16x24xf32>
    %52 = arith.addf %50, %51 : vector<16x24xf32>
    %53 = tpu.concatenate %52, %17 in 0 : vector<16x24xf32>, vector<2x24xf32> -> vector<18x24xf32>
    %c0_30 = arith.constant 0 : index
    %c256 = arith.constant 256 : index
    %54 = vector.load %arg1[%c0_30, %c256] : memref<64x896xf32, #tpu.memory_space<vmem>>, vector<24x96xf32>
    %cst_31 = arith.constant dense<0.000000e+00> : vector<18x96xf32>
    %55 = tpu.matmul %53, %54, %cst_31 {dimension_numbers = #tpu.dot_dimension_numbers<[1], [0], [0], [1], [0, 0, 1, 1], [], []>} : vector<18x24xf32>, vector<24x96xf32>, vector<18x96xf32> -> vector<18x96xf32>
    %c6 = arith.constant 6 : index
    %c768_32 = arith.constant 768 : index
    %56 = vector.load %arg1[%c6, %c768_32] : memref<64x896xf32, #tpu.memory_space<vmem>>, vector<1x96xf32>
    %57 = vector.broadcast %56 : vector<1x96xf32> to vector<18x96xf32>
    %58 = arith.addf %55, %57 : vector<18x96xf32>
    %59 = vector.extract_strided_slice %58 {offsets = [0, 0], sizes = [16, 32], strides = [1, 1]} : vector<18x96xf32> to vector<16x32xf32>
    %60 = vector.extract_strided_slice %58 {offsets = [0, 32], sizes = [16, 64], strides = [1, 1]} : vector<18x96xf32> to vector<16x64xf32>
    %61 = vector.extract_strided_slice %58 {offsets = [0, 32], sizes = [18, 64], strides = [1, 1]} : vector<18x96xf32> to vector<18x64xf32>
    %cst_33 = arith.constant dense<0.000000e+00> : vector<48x64xf32>
    %62 = tpu.matmul %3, %61, %cst_33 {dimension_numbers = #tpu.dot_dimension_numbers<[1], [0], [0], [1], [0, 0, 1, 1], [], []>} : vector<48x18xf32>, vector<18x64xf32>, vector<48x64xf32> -> vector<48x64xf32>
    %63 = vector.extract_strided_slice %62 {offsets = [0, 0], sizes = [16, 64], strides = [1, 1]} : vector<48x64xf32> to vector<16x64xf32>
    %64 = vector.extract_strided_slice %62 {offsets = [16, 0], sizes = [16, 64], strides = [1, 1]} : vector<48x64xf32> to vector<16x64xf32>
    %65 = vector.extract_strided_slice %62 {offsets = [32, 0], sizes = [16, 64], strides = [1, 1]} : vector<48x64xf32> to vector<16x64xf32>
    %66 = vector.extract_strided_slice %63 {offsets = [0, 0], sizes = [16, 32], strides = [1, 1]} : vector<16x64xf32> to vector<16x32xf32>
    %67 = arith.mulf %59, %66 : vector<16x32xf32>
    %68 = vector.extract_strided_slice %60 {offsets = [0, 0], sizes = [16, 32], strides = [1, 1]} : vector<16x64xf32> to vector<16x32xf32>
    %69 = arith.mulf %59, %68 : vector<16x32xf32>
    %70 = vector.extract_strided_slice %64 {offsets = [0, 0], sizes = [16, 32], strides = [1, 1]} : vector<16x64xf32> to vector<16x32xf32>
    %71 = arith.mulf %59, %70 : vector<16x32xf32>
    %72 = vector.extract_strided_slice %65 {offsets = [0, 0], sizes = [16, 32], strides = [1, 1]} : vector<16x64xf32> to vector<16x32xf32>
    %73 = arith.mulf %59, %72 : vector<16x32xf32>
    %74 = tpu.concatenate %67, %69, %71, %73 in 0 : vector<16x32xf32>, vector<16x32xf32>, vector<16x32xf32>, vector<16x32xf32> -> vector<64x32xf32>
    %75 = vector.extract_strided_slice %63 {offsets = [0, 32], sizes = [16, 32], strides = [1, 1]} : vector<16x64xf32> to vector<16x32xf32>
    %76 = vector.extract_strided_slice %60 {offsets = [0, 32], sizes = [16, 32], strides = [1, 1]} : vector<16x64xf32> to vector<16x32xf32>
    %77 = vector.extract_strided_slice %64 {offsets = [0, 32], sizes = [16, 32], strides = [1, 1]} : vector<16x64xf32> to vector<16x32xf32>
    %78 = vector.extract_strided_slice %65 {offsets = [0, 32], sizes = [16, 32], strides = [1, 1]} : vector<16x64xf32> to vector<16x32xf32>
    %79 = tpu.concatenate %75, %76, %77, %78 in 0 : vector<16x32xf32>, vector<16x32xf32>, vector<16x32xf32>, vector<16x32xf32> -> vector<64x32xf32>
    %cst_34 = arith.constant dense<0.000000e+00> : vector<64x4xf32>
    %80 = tpu.matmul %74, %1, %cst_34 {dimension_numbers = #tpu.dot_dimension_numbers<[1], [0], [0], [1], [0, 0, 1, 1], [], []>} : vector<64x32xf32>, vector<32x4xf32>, vector<64x4xf32> -> vector<64x4xf32>
    %81 = vector.extract_strided_slice %80 {offsets = [0, 0], sizes = [16, 4], strides = [1, 1]} : vector<64x4xf32> to vector<16x4xf32>
    %82 = vector.extract_strided_slice %80 {offsets = [16, 0], sizes = [16, 4], strides = [1, 1]} : vector<64x4xf32> to vector<16x4xf32>
    %83 = arith.maximumf %81, %82 : vector<16x4xf32>
    %84 = vector.extract_strided_slice %80 {offsets = [32, 0], sizes = [16, 4], strides = [1, 1]} : vector<64x4xf32> to vector<16x4xf32>
    %85 = vector.extract_strided_slice %80 {offsets = [48, 0], sizes = [16, 4], strides = [1, 1]} : vector<64x4xf32> to vector<16x4xf32>
    %86 = arith.maximumf %84, %85 : vector<16x4xf32>
    %87 = arith.maximumf %83, %86 : vector<16x4xf32>
    %88 = tpu.concatenate %87, %87, %87, %87 in 0 : vector<16x4xf32>, vector<16x4xf32>, vector<16x4xf32>, vector<16x4xf32> -> vector<64x4xf32>
    %89 = arith.subf %80, %88 : vector<64x4xf32>
    %90 = math.exp %89 : vector<64x4xf32>
    %91 = vector.extract_strided_slice %90 {offsets = [0, 0], sizes = [16, 4], strides = [1, 1]} : vector<64x4xf32> to vector<16x4xf32>
    %92 = vector.extract_strided_slice %90 {offsets = [16, 0], sizes = [16, 4], strides = [1, 1]} : vector<64x4xf32> to vector<16x4xf32>
    %93 = arith.addf %91, %92 : vector<16x4xf32>
    %94 = vector.extract_strided_slice %90 {offsets = [32, 0], sizes = [16, 4], strides = [1, 1]} : vector<64x4xf32> to vector<16x4xf32>
    %95 = arith.addf %93, %94 : vector<16x4xf32>
    %96 = vector.extract_strided_slice %90 {offsets = [48, 0], sizes = [16, 4], strides = [1, 1]} : vector<64x4xf32> to vector<16x4xf32>
    %97 = arith.addf %95, %96 : vector<16x4xf32>
    %98 = tpu.reciprocal %97 : vector<16x4xf32> -> vector<16x4xf32>
    %99 = tpu.concatenate %98, %98, %98, %98 in 0 : vector<16x4xf32>, vector<16x4xf32>, vector<16x4xf32>, vector<16x4xf32> -> vector<64x4xf32>
    %100 = arith.mulf %90, %99 : vector<64x4xf32>
    %cst_35 = arith.constant dense<0.000000e+00> : vector<64x32xf32>
    %101 = tpu.matmul %100, %2, %cst_35 {dimension_numbers = #tpu.dot_dimension_numbers<[1], [0], [0], [1], [0, 0, 1, 1], [], []>} : vector<64x4xf32>, vector<4x32xf32>, vector<64x32xf32> -> vector<64x32xf32>
    %102 = arith.mulf %101, %79 : vector<64x32xf32>
    %103 = vector.extract_strided_slice %102 {offsets = [0, 0], sizes = [16, 32], strides = [1, 1]} : vector<64x32xf32> to vector<16x32xf32>
    %104 = vector.extract_strided_slice %102 {offsets = [16, 0], sizes = [16, 32], strides = [1, 1]} : vector<64x32xf32> to vector<16x32xf32>
    %105 = arith.addf %103, %104 : vector<16x32xf32>
    %106 = vector.extract_strided_slice %102 {offsets = [32, 0], sizes = [16, 32], strides = [1, 1]} : vector<64x32xf32> to vector<16x32xf32>
    %107 = arith.addf %105, %106 : vector<16x32xf32>
    %108 = vector.extract_strided_slice %102 {offsets = [48, 0], sizes = [16, 32], strides = [1, 1]} : vector<64x32xf32> to vector<16x32xf32>
    %109 = arith.addf %107, %108 : vector<16x32xf32>
    %c0_36 = arith.constant 0 : index
    %c384 = arith.constant 384 : index
    %110 = vector.load %arg1[%c0_36, %c384] : memref<64x896xf32, #tpu.memory_space<vmem>>, vector<32x24xf32>
    %cst_37 = arith.constant dense<0.000000e+00> : vector<16x24xf32>
    %111 = tpu.matmul %109, %110, %cst_37 {dimension_numbers = #tpu.dot_dimension_numbers<[1], [0], [0], [1], [0, 0, 1, 1], [], []>} : vector<16x32xf32>, vector<32x24xf32>, vector<16x24xf32> -> vector<16x24xf32>
    %c7 = arith.constant 7 : index
    %c768_38 = arith.constant 768 : index
    %112 = vector.load %arg1[%c7, %c768_38] : memref<64x896xf32, #tpu.memory_space<vmem>>, vector<1x24xf32>
    %113 = vector.broadcast %112 : vector<1x24xf32> to vector<16x24xf32>
    %114 = arith.addf %111, %113 : vector<16x24xf32>
    %c4 = arith.constant 4 : index
    %c768_39 = arith.constant 768 : index
    %115 = vector.load %arg1[%c4, %c768_39] : memref<64x896xf32, #tpu.memory_space<vmem>>, vector<1x24xf32>
    %c5 = arith.constant 5 : index
    %c768_40 = arith.constant 768 : index
    %116 = vector.load %arg1[%c5, %c768_40] : memref<64x896xf32, #tpu.memory_space<vmem>>, vector<1x24xf32>
    %cst_41 = arith.constant dense<0.000000e+00> : vector<16xf32>
    %117 = vector.multi_reduction <add>, %114, %cst_41 [1] : vector<16x24xf32> to vector<16xf32>
    %118 = vector.shape_cast %117 : vector<16xf32> to vector<16x1xf32>
    %cst_42 = arith.constant 2.400000e+01 : f32
    %119 = vector.broadcast %cst_42 : f32 to vector<16x1xf32>
    %120 = arith.divf %118, %119 : vector<16x1xf32>
    %121 = vector.broadcast %120 : vector<16x1xf32> to vector<16x24xf32>
    %122 = arith.subf %114, %121 : vector<16x24xf32>
    %123 = arith.mulf %122, %122 : vector<16x24xf32>
    %cst_43 = arith.constant dense<0.000000e+00> : vector<16xf32>
    %124 = vector.multi_reduction <add>, %123, %cst_43 [1] : vector<16x24xf32> to vector<16xf32>
    %125 = vector.shape_cast %124 : vector<16xf32> to vector<16x1xf32>
    %cst_44 = arith.constant 2.400000e+01 : f32
    %126 = vector.broadcast %cst_44 : f32 to vector<16x1xf32>
    %127 = arith.divf %125, %126 : vector<16x1xf32>
    %cst_45 = arith.constant 9.99999974E-6 : f32
    %128 = vector.broadcast %cst_45 : f32 to vector<16x1xf32>
    %129 = arith.addf %127, %128 : vector<16x1xf32>
    %130 = math.rsqrt %129 : vector<16x1xf32>
    %131 = vector.broadcast %130 : vector<16x1xf32> to vector<16x24xf32>
    %132 = arith.mulf %122, %131 : vector<16x24xf32>
    %133 = vector.broadcast %115 : vector<1x24xf32> to vector<16x24xf32>
    %134 = arith.mulf %132, %133 : vector<16x24xf32>
    %135 = vector.broadcast %116 : vector<1x24xf32> to vector<16x24xf32>
    %136 = arith.addf %134, %135 : vector<16x24xf32>
    %cst_46 = arith.constant 0.000000e+00 : f32
    %137 = vector.broadcast %cst_46 : f32 to vector<16x24xf32>
    %138 = arith.cmpf oge, %136, %137 : vector<16x24xf32>
    %cst_47 = arith.constant 0.00999999977 : f32
    %139 = vector.broadcast %cst_47 : f32 to vector<16x24xf32>
    %140 = arith.mulf %139, %136 : vector<16x24xf32>
    %141 = arith.select %138, %136, %140 : vector<16x24xi1>, vector<16x24xf32>
    %142 = tpu.concatenate %141, %17 in 0 : vector<16x24xf32>, vector<2x24xf32> -> vector<18x24xf32>
    %c0_48 = arith.constant 0 : index
    %c512 = arith.constant 512 : index
    %143 = vector.load %arg1[%c0_48, %c512] : memref<64x896xf32, #tpu.memory_space<vmem>>, vector<24x96xf32>
    %cst_49 = arith.constant dense<0.000000e+00> : vector<18x96xf32>
    %144 = tpu.matmul %142, %143, %cst_49 {dimension_numbers = #tpu.dot_dimension_numbers<[1], [0], [0], [1], [0, 0, 1, 1], [], []>} : vector<18x24xf32>, vector<24x96xf32>, vector<18x96xf32> -> vector<18x96xf32>
    %c8_50 = arith.constant 8 : index
    %c768_51 = arith.constant 768 : index
    %145 = vector.load %arg1[%c8_50, %c768_51] : memref<64x896xf32, #tpu.memory_space<vmem>>, vector<1x96xf32>
    %146 = vector.broadcast %145 : vector<1x96xf32> to vector<18x96xf32>
    %147 = arith.addf %144, %146 : vector<18x96xf32>
    %148 = vector.extract_strided_slice %147 {offsets = [16, 0], sizes = [2, 32], strides = [1, 1]} : vector<18x96xf32> to vector<2x32xf32>
    %149 = vector.extract_strided_slice %147 {offsets = [0, 32], sizes = [16, 32], strides = [1, 1]} : vector<18x96xf32> to vector<16x32xf32>
    %150 = vector.extract_strided_slice %147 {offsets = [0, 64], sizes = [16, 32], strides = [1, 1]} : vector<18x96xf32> to vector<16x32xf32>
    %151 = vector.extract_strided_slice %147 {offsets = [16, 32], sizes = [2, 32], strides = [1, 1]} : vector<18x96xf32> to vector<2x32xf32>
    %152 = vector.extract_strided_slice %147 {offsets = [16, 64], sizes = [2, 32], strides = [1, 1]} : vector<18x96xf32> to vector<2x32xf32>
    %153 = vector.extract_strided_slice %148 {offsets = [0, 0], sizes = [1, 32], strides = [1, 1]} : vector<2x32xf32> to vector<1x32xf32>
    %154 = vector.shape_cast %153 : vector<1x32xf32> to vector<1x32xf32>
    %155 = vector.broadcast %154 : vector<1x32xf32> to vector<8x32xf32>
    %156 = vector.extract_strided_slice %148 {offsets = [1, 0], sizes = [1, 32], strides = [1, 1]} : vector<2x32xf32> to vector<1x32xf32>
    %157 = vector.shape_cast %156 : vector<1x32xf32> to vector<1x32xf32>
    %158 = vector.broadcast %157 : vector<1x32xf32> to vector<8x32xf32>
    %159 = tpu.concatenate %155, %158 in 0 : vector<8x32xf32>, vector<8x32xf32> -> vector<16x32xf32>
    %160 = arith.mulf %159, %149 : vector<16x32xf32>
    %161 = arith.mulf %148, %151 : vector<2x32xf32>
    %162 = tpu.concatenate %160, %161 in 0 : vector<16x32xf32>, vector<2x32xf32> -> vector<18x32xf32>
    %cst_52 = arith.constant dense<0.000000e+00> : vector<18x4xf32>
    %163 = tpu.matmul %162, %1, %cst_52 {dimension_numbers = #tpu.dot_dimension_numbers<[1], [0], [0], [1], [0, 0, 1, 1], [], []>} : vector<18x32xf32>, vector<32x4xf32>, vector<18x4xf32> -> vector<18x4xf32>
    %164 = vector.extract_strided_slice %163 {offsets = [0, 0], sizes = [16, 4], strides = [1, 1]} : vector<18x4xf32> to vector<16x4xf32>
    %165 = vector.broadcast %14 : vector<16x1xf32> to vector<16x4xf32>
    %166 = arith.addf %164, %165 : vector<16x4xf32>
    %167 = vector.extract_strided_slice %163 {offsets = [16, 0], sizes = [2, 4], strides = [1, 1]} : vector<18x4xf32> to vector<2x4xf32>
    %168 = vector.extract_strided_slice %166 {offsets = [0, 0], sizes = [8, 4], strides = [1, 1]} : vector<16x4xf32> to vector<8x4xf32>
    %cst_53 = arith.constant dense<0xFF800000> : vector<4xf32>
    %169 = vector.multi_reduction <maximumf>, %168, %cst_53 [0] : vector<8x4xf32> to vector<4xf32>
    %170 = vector.shape_cast %169 : vector<4xf32> to vector<1x4xf32>
    %171 = vector.extract_strided_slice %166 {offsets = [8, 0], sizes = [8, 4], strides = [1, 1]} : vector<16x4xf32> to vector<8x4xf32>
    %cst_54 = arith.constant dense<0xFF800000> : vector<4xf32>
    %172 = vector.multi_reduction <maximumf>, %171, %cst_54 [0] : vector<8x4xf32> to vector<4xf32>
    %173 = vector.shape_cast %172 : vector<4xf32> to vector<1x4xf32>
    %174 = tpu.concatenate %170, %173 in 0 : vector<1x4xf32>, vector<1x4xf32> -> vector<2x4xf32>
    %175 = arith.maximumf %174, %167 : vector<2x4xf32>
    %176 = vector.extract_strided_slice %175 {offsets = [0, 0], sizes = [1, 4], strides = [1, 1]} : vector<2x4xf32> to vector<1x4xf32>
    %177 = vector.shape_cast %176 : vector<1x4xf32> to vector<1x4xf32>
    %178 = vector.broadcast %177 : vector<1x4xf32> to vector<8x4xf32>
    %179 = vector.extract_strided_slice %175 {offsets = [1, 0], sizes = [1, 4], strides = [1, 1]} : vector<2x4xf32> to vector<1x4xf32>
    %180 = vector.shape_cast %179 : vector<1x4xf32> to vector<1x4xf32>
    %181 = vector.broadcast %180 : vector<1x4xf32> to vector<8x4xf32>
    %182 = tpu.concatenate %178, %181 in 0 : vector<8x4xf32>, vector<8x4xf32> -> vector<16x4xf32>
    %183 = arith.subf %166, %182 : vector<16x4xf32>
    %184 = math.exp %183 : vector<16x4xf32>
    %185 = arith.subf %167, %175 : vector<2x4xf32>
    %186 = math.exp %185 : vector<2x4xf32>
    %187 = tpu.concatenate %184, %186 in 0 : vector<16x4xf32>, vector<2x4xf32> -> vector<18x4xf32>
    %cst_55 = arith.constant dense<0.000000e+00> : vector<18x32xf32>
    %188 = tpu.matmul %187, %2, %cst_55 {dimension_numbers = #tpu.dot_dimension_numbers<[1], [0], [0], [1], [0, 0, 1, 1], [], []>} : vector<18x4xf32>, vector<4x32xf32>, vector<18x32xf32> -> vector<18x32xf32>
    %189 = vector.extract_strided_slice %188 {offsets = [0, 0], sizes = [16, 32], strides = [1, 1]} : vector<18x32xf32> to vector<16x32xf32>
    %190 = arith.mulf %189, %150 : vector<16x32xf32>
    %191 = tpu.concatenate %190, %184 in 1 : vector<16x32xf32>, vector<16x4xf32> -> vector<16x36xf32>
    %cst_56 = arith.constant dense<0.000000e+00> : vector<2x36xf32>
    %192 = tpu.matmul %0, %191, %cst_56 {dimension_numbers = #tpu.dot_dimension_numbers<[1], [0], [0], [1], [0, 0, 1, 1], [], []>} : vector<2x16xf32>, vector<16x36xf32>, vector<2x36xf32> -> vector<2x36xf32>
    %193 = vector.extract_strided_slice %192 {offsets = [0, 0], sizes = [2, 32], strides = [1, 1]} : vector<2x36xf32> to vector<2x32xf32>
    %194 = vector.extract_strided_slice %192 {offsets = [0, 32], sizes = [2, 4], strides = [1, 1]} : vector<2x36xf32> to vector<2x4xf32>
    %195 = arith.addf %194, %186 : vector<2x4xf32>
    %cst_57 = arith.constant dense<0.000000e+00> : vector<2x32xf32>
    %196 = tpu.matmul %195, %2, %cst_57 {dimension_numbers = #tpu.dot_dimension_numbers<[1], [0], [0], [1], [0, 0, 1, 1], [], []>} : vector<2x4xf32>, vector<4x32xf32>, vector<2x32xf32> -> vector<2x32xf32>
    %197 = tpu.reciprocal %196 : vector<2x32xf32> -> vector<2x32xf32>
    %198 = vector.extract_strided_slice %188 {offsets = [16, 0], sizes = [2, 32], strides = [1, 1]} : vector<18x32xf32> to vector<2x32xf32>
    %199 = arith.mulf %198, %152 : vector<2x32xf32>
    %200 = arith.addf %193, %199 : vector<2x32xf32>
    %201 = arith.mulf %200, %197 : vector<2x32xf32>
    %c0_58 = arith.constant 0 : index
    %c640 = arith.constant 640 : index
    %202 = vector.load %arg1[%c0_58, %c640] : memref<64x896xf32, #tpu.memory_space<vmem>>, vector<32x24xf32>
    %cst_59 = arith.constant dense<0.000000e+00> : vector<2x24xf32>
    %203 = tpu.matmul %201, %202, %cst_59 {dimension_numbers = #tpu.dot_dimension_numbers<[1], [0], [0], [1], [0, 0, 1, 1], [], []>} : vector<2x32xf32>, vector<32x24xf32>, vector<2x24xf32> -> vector<2x24xf32>
    %c9 = arith.constant 9 : index
    %c768_60 = arith.constant 768 : index
    %204 = vector.load %arg1[%c9, %c768_60] : memref<64x896xf32, #tpu.memory_space<vmem>>, vector<1x24xf32>
    %205 = vector.broadcast %204 : vector<1x24xf32> to vector<2x24xf32>
    %206 = arith.addf %203, %205 : vector<2x24xf32>
    %cst_61 = arith.constant 0.000000e+00 : f32
    %207 = vector.broadcast %cst_61 : f32 to vector<2x24xf32>
    %208 = arith.cmpf oge, %206, %207 : vector<2x24xf32>
    %cst_62 = arith.constant 0.00999999977 : f32
    %209 = vector.broadcast %cst_62 : f32 to vector<2x24xf32>
    %210 = arith.mulf %209, %206 : vector<2x24xf32>
    %211 = arith.select %208, %206, %210 : vector<2x24xi1>, vector<2x24xf32>
    %212 = vector.broadcast %12 : vector<16x1xf32> to vector<16x24xf32>
    %213 = arith.mulf %141, %212 : vector<16x24xf32>
    %c32_63 = arith.constant 32 : index
    %c0_64 = arith.constant 0 : index
    %214 = vector.load %arg1[%c32_63, %c0_64] : memref<64x896xf32, #tpu.memory_space<vmem>>, vector<24x32xf32>
    %cst_65 = arith.constant dense<0.000000e+00> : vector<16x32xf32>
    %215 = tpu.matmul %213, %214, %cst_65 {dimension_numbers = #tpu.dot_dimension_numbers<[1], [0], [0], [1], [0, 0, 1, 1], [], []>} : vector<16x24xf32>, vector<24x32xf32>, vector<16x32xf32> -> vector<16x32xf32>
    %c32_66 = arith.constant 32 : index
    %c768_67 = arith.constant 768 : index
    %216 = vector.load %arg1[%c32_66, %c768_67] : memref<64x896xf32, #tpu.memory_space<vmem>>, vector<1x32xf32>
    %217 = vector.broadcast %216 : vector<1x32xf32> to vector<16x32xf32>
    %218 = arith.addf %215, %217 : vector<16x32xf32>
    %cst_68 = arith.constant 0.000000e+00 : f32
    %219 = vector.broadcast %cst_68 : f32 to vector<16x32xf32>
    %220 = arith.maximumf %218, %219 : vector<16x32xf32>
    %c32_69 = arith.constant 32 : index
    %c128_70 = arith.constant 128 : index
    %221 = vector.load %arg1[%c32_69, %c128_70] : memref<64x896xf32, #tpu.memory_space<vmem>>, vector<32x24xf32>
    %cst_71 = arith.constant dense<0.000000e+00> : vector<16x24xf32>
    %222 = tpu.matmul %220, %221, %cst_71 {dimension_numbers = #tpu.dot_dimension_numbers<[1], [0], [0], [1], [0, 0, 1, 1], [], []>} : vector<16x32xf32>, vector<32x24xf32>, vector<16x24xf32> -> vector<16x24xf32>
    %c33 = arith.constant 33 : index
    %c768_72 = arith.constant 768 : index
    %223 = vector.load %arg1[%c33, %c768_72] : memref<64x896xf32, #tpu.memory_space<vmem>>, vector<1x24xf32>
    %224 = vector.broadcast %223 : vector<1x24xf32> to vector<16x24xf32>
    %225 = arith.addf %222, %224 : vector<16x24xf32>
    %226 = arith.addf %225, %213 : vector<16x24xf32>
    %c34 = arith.constant 34 : index
    %c768_73 = arith.constant 768 : index
    %227 = vector.load %arg1[%c34, %c768_73] : memref<64x896xf32, #tpu.memory_space<vmem>>, vector<1x24xf32>
    %c35 = arith.constant 35 : index
    %c768_74 = arith.constant 768 : index
    %228 = vector.load %arg1[%c35, %c768_74] : memref<64x896xf32, #tpu.memory_space<vmem>>, vector<1x24xf32>
    %cst_75 = arith.constant dense<0.000000e+00> : vector<16xf32>
    %229 = vector.multi_reduction <add>, %226, %cst_75 [1] : vector<16x24xf32> to vector<16xf32>
    %230 = vector.shape_cast %229 : vector<16xf32> to vector<16x1xf32>
    %cst_76 = arith.constant 2.400000e+01 : f32
    %231 = vector.broadcast %cst_76 : f32 to vector<16x1xf32>
    %232 = arith.divf %230, %231 : vector<16x1xf32>
    %233 = vector.broadcast %232 : vector<16x1xf32> to vector<16x24xf32>
    %234 = arith.subf %226, %233 : vector<16x24xf32>
    %235 = arith.mulf %234, %234 : vector<16x24xf32>
    %cst_77 = arith.constant dense<0.000000e+00> : vector<16xf32>
    %236 = vector.multi_reduction <add>, %235, %cst_77 [1] : vector<16x24xf32> to vector<16xf32>
    %237 = vector.shape_cast %236 : vector<16xf32> to vector<16x1xf32>
    %cst_78 = arith.constant 2.400000e+01 : f32
    %238 = vector.broadcast %cst_78 : f32 to vector<16x1xf32>
    %239 = arith.divf %237, %238 : vector<16x1xf32>
    %cst_79 = arith.constant 9.99999974E-6 : f32
    %240 = vector.broadcast %cst_79 : f32 to vector<16x1xf32>
    %241 = arith.addf %239, %240 : vector<16x1xf32>
    %242 = math.rsqrt %241 : vector<16x1xf32>
    %243 = vector.broadcast %242 : vector<16x1xf32> to vector<16x24xf32>
    %244 = arith.mulf %234, %243 : vector<16x24xf32>
    %245 = vector.broadcast %227 : vector<1x24xf32> to vector<16x24xf32>
    %246 = arith.mulf %244, %245 : vector<16x24xf32>
    %247 = vector.broadcast %228 : vector<1x24xf32> to vector<16x24xf32>
    %248 = arith.addf %246, %247 : vector<16x24xf32>
    %249 = tpu.concatenate %248, %211 in 0 : vector<16x24xf32>, vector<2x24xf32> -> vector<18x24xf32>
    %c32_80 = arith.constant 32 : index
    %c256_81 = arith.constant 256 : index
    %250 = vector.load %arg1[%c32_80, %c256_81] : memref<64x896xf32, #tpu.memory_space<vmem>>, vector<24x96xf32>
    %cst_82 = arith.constant dense<0.000000e+00> : vector<18x96xf32>
    %251 = tpu.matmul %249, %250, %cst_82 {dimension_numbers = #tpu.dot_dimension_numbers<[1], [0], [0], [1], [0, 0, 1, 1], [], []>} : vector<18x24xf32>, vector<24x96xf32>, vector<18x96xf32> -> vector<18x96xf32>
    %c38 = arith.constant 38 : index
    %c768_83 = arith.constant 768 : index
    %252 = vector.load %arg1[%c38, %c768_83] : memref<64x896xf32, #tpu.memory_space<vmem>>, vector<1x96xf32>
    %253 = vector.broadcast %252 : vector<1x96xf32> to vector<18x96xf32>
    %254 = arith.addf %251, %253 : vector<18x96xf32>
    %255 = vector.extract_strided_slice %254 {offsets = [0, 0], sizes = [16, 32], strides = [1, 1]} : vector<18x96xf32> to vector<16x32xf32>
    %256 = vector.extract_strided_slice %254 {offsets = [0, 32], sizes = [16, 64], strides = [1, 1]} : vector<18x96xf32> to vector<16x64xf32>
    %257 = vector.extract_strided_slice %254 {offsets = [0, 32], sizes = [18, 64], strides = [1, 1]} : vector<18x96xf32> to vector<18x64xf32>
    %cst_84 = arith.constant dense<0.000000e+00> : vector<48x64xf32>
    %258 = tpu.matmul %3, %257, %cst_84 {dimension_numbers = #tpu.dot_dimension_numbers<[1], [0], [0], [1], [0, 0, 1, 1], [], []>} : vector<48x18xf32>, vector<18x64xf32>, vector<48x64xf32> -> vector<48x64xf32>
    %259 = vector.extract_strided_slice %258 {offsets = [0, 0], sizes = [16, 64], strides = [1, 1]} : vector<48x64xf32> to vector<16x64xf32>
    %260 = vector.extract_strided_slice %258 {offsets = [16, 0], sizes = [16, 64], strides = [1, 1]} : vector<48x64xf32> to vector<16x64xf32>
    %261 = vector.extract_strided_slice %258 {offsets = [32, 0], sizes = [16, 64], strides = [1, 1]} : vector<48x64xf32> to vector<16x64xf32>
    %262 = vector.extract_strided_slice %259 {offsets = [0, 0], sizes = [16, 32], strides = [1, 1]} : vector<16x64xf32> to vector<16x32xf32>
    %263 = arith.mulf %255, %262 : vector<16x32xf32>
    %264 = vector.extract_strided_slice %256 {offsets = [0, 0], sizes = [16, 32], strides = [1, 1]} : vector<16x64xf32> to vector<16x32xf32>
    %265 = arith.mulf %255, %264 : vector<16x32xf32>
    %266 = vector.extract_strided_slice %260 {offsets = [0, 0], sizes = [16, 32], strides = [1, 1]} : vector<16x64xf32> to vector<16x32xf32>
    %267 = arith.mulf %255, %266 : vector<16x32xf32>
    %268 = vector.extract_strided_slice %261 {offsets = [0, 0], sizes = [16, 32], strides = [1, 1]} : vector<16x64xf32> to vector<16x32xf32>
    %269 = arith.mulf %255, %268 : vector<16x32xf32>
    %270 = tpu.concatenate %263, %265, %267, %269 in 0 : vector<16x32xf32>, vector<16x32xf32>, vector<16x32xf32>, vector<16x32xf32> -> vector<64x32xf32>
    %271 = vector.extract_strided_slice %259 {offsets = [0, 32], sizes = [16, 32], strides = [1, 1]} : vector<16x64xf32> to vector<16x32xf32>
    %272 = vector.extract_strided_slice %256 {offsets = [0, 32], sizes = [16, 32], strides = [1, 1]} : vector<16x64xf32> to vector<16x32xf32>
    %273 = vector.extract_strided_slice %260 {offsets = [0, 32], sizes = [16, 32], strides = [1, 1]} : vector<16x64xf32> to vector<16x32xf32>
    %274 = vector.extract_strided_slice %261 {offsets = [0, 32], sizes = [16, 32], strides = [1, 1]} : vector<16x64xf32> to vector<16x32xf32>
    %275 = tpu.concatenate %271, %272, %273, %274 in 0 : vector<16x32xf32>, vector<16x32xf32>, vector<16x32xf32>, vector<16x32xf32> -> vector<64x32xf32>
    %cst_85 = arith.constant dense<0.000000e+00> : vector<64x4xf32>
    %276 = tpu.matmul %270, %1, %cst_85 {dimension_numbers = #tpu.dot_dimension_numbers<[1], [0], [0], [1], [0, 0, 1, 1], [], []>} : vector<64x32xf32>, vector<32x4xf32>, vector<64x4xf32> -> vector<64x4xf32>
    %277 = vector.extract_strided_slice %276 {offsets = [0, 0], sizes = [16, 4], strides = [1, 1]} : vector<64x4xf32> to vector<16x4xf32>
    %278 = vector.extract_strided_slice %276 {offsets = [16, 0], sizes = [16, 4], strides = [1, 1]} : vector<64x4xf32> to vector<16x4xf32>
    %279 = arith.maximumf %277, %278 : vector<16x4xf32>
    %280 = vector.extract_strided_slice %276 {offsets = [32, 0], sizes = [16, 4], strides = [1, 1]} : vector<64x4xf32> to vector<16x4xf32>
    %281 = vector.extract_strided_slice %276 {offsets = [48, 0], sizes = [16, 4], strides = [1, 1]} : vector<64x4xf32> to vector<16x4xf32>
    %282 = arith.maximumf %280, %281 : vector<16x4xf32>
    %283 = arith.maximumf %279, %282 : vector<16x4xf32>
    %284 = tpu.concatenate %283, %283, %283, %283 in 0 : vector<16x4xf32>, vector<16x4xf32>, vector<16x4xf32>, vector<16x4xf32> -> vector<64x4xf32>
    %285 = arith.subf %276, %284 : vector<64x4xf32>
    %286 = math.exp %285 : vector<64x4xf32>
    %287 = vector.extract_strided_slice %286 {offsets = [0, 0], sizes = [16, 4], strides = [1, 1]} : vector<64x4xf32> to vector<16x4xf32>
    %288 = vector.extract_strided_slice %286 {offsets = [16, 0], sizes = [16, 4], strides = [1, 1]} : vector<64x4xf32> to vector<16x4xf32>
    %289 = arith.addf %287, %288 : vector<16x4xf32>
    %290 = vector.extract_strided_slice %286 {offsets = [32, 0], sizes = [16, 4], strides = [1, 1]} : vector<64x4xf32> to vector<16x4xf32>
    %291 = arith.addf %289, %290 : vector<16x4xf32>
    %292 = vector.extract_strided_slice %286 {offsets = [48, 0], sizes = [16, 4], strides = [1, 1]} : vector<64x4xf32> to vector<16x4xf32>
    %293 = arith.addf %291, %292 : vector<16x4xf32>
    %294 = tpu.reciprocal %293 : vector<16x4xf32> -> vector<16x4xf32>
    %295 = tpu.concatenate %294, %294, %294, %294 in 0 : vector<16x4xf32>, vector<16x4xf32>, vector<16x4xf32>, vector<16x4xf32> -> vector<64x4xf32>
    %296 = arith.mulf %286, %295 : vector<64x4xf32>
    %cst_86 = arith.constant dense<0.000000e+00> : vector<64x32xf32>
    %297 = tpu.matmul %296, %2, %cst_86 {dimension_numbers = #tpu.dot_dimension_numbers<[1], [0], [0], [1], [0, 0, 1, 1], [], []>} : vector<64x4xf32>, vector<4x32xf32>, vector<64x32xf32> -> vector<64x32xf32>
    %298 = arith.mulf %297, %275 : vector<64x32xf32>
    %299 = vector.extract_strided_slice %298 {offsets = [0, 0], sizes = [16, 32], strides = [1, 1]} : vector<64x32xf32> to vector<16x32xf32>
    %300 = vector.extract_strided_slice %298 {offsets = [16, 0], sizes = [16, 32], strides = [1, 1]} : vector<64x32xf32> to vector<16x32xf32>
    %301 = arith.addf %299, %300 : vector<16x32xf32>
    %302 = vector.extract_strided_slice %298 {offsets = [32, 0], sizes = [16, 32], strides = [1, 1]} : vector<64x32xf32> to vector<16x32xf32>
    %303 = arith.addf %301, %302 : vector<16x32xf32>
    %304 = vector.extract_strided_slice %298 {offsets = [48, 0], sizes = [16, 32], strides = [1, 1]} : vector<64x32xf32> to vector<16x32xf32>
    %305 = arith.addf %303, %304 : vector<16x32xf32>
    %c32_87 = arith.constant 32 : index
    %c384_88 = arith.constant 384 : index
    %306 = vector.load %arg1[%c32_87, %c384_88] : memref<64x896xf32, #tpu.memory_space<vmem>>, vector<32x24xf32>
    %cst_89 = arith.constant dense<0.000000e+00> : vector<16x24xf32>
    %307 = tpu.matmul %305, %306, %cst_89 {dimension_numbers = #tpu.dot_dimension_numbers<[1], [0], [0], [1], [0, 0, 1, 1], [], []>} : vector<16x32xf32>, vector<32x24xf32>, vector<16x24xf32> -> vector<16x24xf32>
    %c39 = arith.constant 39 : index
    %c768_90 = arith.constant 768 : index
    %308 = vector.load %arg1[%c39, %c768_90] : memref<64x896xf32, #tpu.memory_space<vmem>>, vector<1x24xf32>
    %309 = vector.broadcast %308 : vector<1x24xf32> to vector<16x24xf32>
    %310 = arith.addf %307, %309 : vector<16x24xf32>
    %c36 = arith.constant 36 : index
    %c768_91 = arith.constant 768 : index
    %311 = vector.load %arg1[%c36, %c768_91] : memref<64x896xf32, #tpu.memory_space<vmem>>, vector<1x24xf32>
    %c37 = arith.constant 37 : index
    %c768_92 = arith.constant 768 : index
    %312 = vector.load %arg1[%c37, %c768_92] : memref<64x896xf32, #tpu.memory_space<vmem>>, vector<1x24xf32>
    %cst_93 = arith.constant dense<0.000000e+00> : vector<16xf32>
    %313 = vector.multi_reduction <add>, %310, %cst_93 [1] : vector<16x24xf32> to vector<16xf32>
    %314 = vector.shape_cast %313 : vector<16xf32> to vector<16x1xf32>
    %cst_94 = arith.constant 2.400000e+01 : f32
    %315 = vector.broadcast %cst_94 : f32 to vector<16x1xf32>
    %316 = arith.divf %314, %315 : vector<16x1xf32>
    %317 = vector.broadcast %316 : vector<16x1xf32> to vector<16x24xf32>
    %318 = arith.subf %310, %317 : vector<16x24xf32>
    %319 = arith.mulf %318, %318 : vector<16x24xf32>
    %cst_95 = arith.constant dense<0.000000e+00> : vector<16xf32>
    %320 = vector.multi_reduction <add>, %319, %cst_95 [1] : vector<16x24xf32> to vector<16xf32>
    %321 = vector.shape_cast %320 : vector<16xf32> to vector<16x1xf32>
    %cst_96 = arith.constant 2.400000e+01 : f32
    %322 = vector.broadcast %cst_96 : f32 to vector<16x1xf32>
    %323 = arith.divf %321, %322 : vector<16x1xf32>
    %cst_97 = arith.constant 9.99999974E-6 : f32
    %324 = vector.broadcast %cst_97 : f32 to vector<16x1xf32>
    %325 = arith.addf %323, %324 : vector<16x1xf32>
    %326 = math.rsqrt %325 : vector<16x1xf32>
    %327 = vector.broadcast %326 : vector<16x1xf32> to vector<16x24xf32>
    %328 = arith.mulf %318, %327 : vector<16x24xf32>
    %329 = vector.broadcast %311 : vector<1x24xf32> to vector<16x24xf32>
    %330 = arith.mulf %328, %329 : vector<16x24xf32>
    %331 = vector.broadcast %312 : vector<1x24xf32> to vector<16x24xf32>
    %332 = arith.addf %330, %331 : vector<16x24xf32>
    %cst_98 = arith.constant 0.000000e+00 : f32
    %333 = vector.broadcast %cst_98 : f32 to vector<16x24xf32>
    %334 = arith.cmpf oge, %332, %333 : vector<16x24xf32>
    %cst_99 = arith.constant 0.00999999977 : f32
    %335 = vector.broadcast %cst_99 : f32 to vector<16x24xf32>
    %336 = arith.mulf %335, %332 : vector<16x24xf32>
    %337 = arith.select %334, %332, %336 : vector<16x24xi1>, vector<16x24xf32>
    %338 = tpu.concatenate %337, %211 in 0 : vector<16x24xf32>, vector<2x24xf32> -> vector<18x24xf32>
    %c32_100 = arith.constant 32 : index
    %c512_101 = arith.constant 512 : index
    %339 = vector.load %arg1[%c32_100, %c512_101] : memref<64x896xf32, #tpu.memory_space<vmem>>, vector<24x96xf32>
    %cst_102 = arith.constant dense<0.000000e+00> : vector<18x96xf32>
    %340 = tpu.matmul %338, %339, %cst_102 {dimension_numbers = #tpu.dot_dimension_numbers<[1], [0], [0], [1], [0, 0, 1, 1], [], []>} : vector<18x24xf32>, vector<24x96xf32>, vector<18x96xf32> -> vector<18x96xf32>
    %c40_103 = arith.constant 40 : index
    %c768_104 = arith.constant 768 : index
    %341 = vector.load %arg1[%c40_103, %c768_104] : memref<64x896xf32, #tpu.memory_space<vmem>>, vector<1x96xf32>
    %342 = vector.broadcast %341 : vector<1x96xf32> to vector<18x96xf32>
    %343 = arith.addf %340, %342 : vector<18x96xf32>
    %344 = vector.extract_strided_slice %343 {offsets = [16, 0], sizes = [2, 32], strides = [1, 1]} : vector<18x96xf32> to vector<2x32xf32>
    %345 = vector.extract_strided_slice %343 {offsets = [0, 32], sizes = [16, 32], strides = [1, 1]} : vector<18x96xf32> to vector<16x32xf32>
    %346 = vector.extract_strided_slice %343 {offsets = [0, 64], sizes = [16, 32], strides = [1, 1]} : vector<18x96xf32> to vector<16x32xf32>
    %347 = vector.extract_strided_slice %343 {offsets = [16, 32], sizes = [2, 32], strides = [1, 1]} : vector<18x96xf32> to vector<2x32xf32>
    %348 = vector.extract_strided_slice %343 {offsets = [16, 64], sizes = [2, 32], strides = [1, 1]} : vector<18x96xf32> to vector<2x32xf32>
    %349 = vector.extract_strided_slice %344 {offsets = [0, 0], sizes = [1, 32], strides = [1, 1]} : vector<2x32xf32> to vector<1x32xf32>
    %350 = vector.shape_cast %349 : vector<1x32xf32> to vector<1x32xf32>
    %351 = vector.broadcast %350 : vector<1x32xf32> to vector<8x32xf32>
    %352 = vector.extract_strided_slice %344 {offsets = [1, 0], sizes = [1, 32], strides = [1, 1]} : vector<2x32xf32> to vector<1x32xf32>
    %353 = vector.shape_cast %352 : vector<1x32xf32> to vector<1x32xf32>
    %354 = vector.broadcast %353 : vector<1x32xf32> to vector<8x32xf32>
    %355 = tpu.concatenate %351, %354 in 0 : vector<8x32xf32>, vector<8x32xf32> -> vector<16x32xf32>
    %356 = arith.mulf %355, %345 : vector<16x32xf32>
    %357 = arith.mulf %344, %347 : vector<2x32xf32>
    %358 = tpu.concatenate %356, %357 in 0 : vector<16x32xf32>, vector<2x32xf32> -> vector<18x32xf32>
    %cst_105 = arith.constant dense<0.000000e+00> : vector<18x4xf32>
    %359 = tpu.matmul %358, %1, %cst_105 {dimension_numbers = #tpu.dot_dimension_numbers<[1], [0], [0], [1], [0, 0, 1, 1], [], []>} : vector<18x32xf32>, vector<32x4xf32>, vector<18x4xf32> -> vector<18x4xf32>
    %360 = vector.extract_strided_slice %359 {offsets = [0, 0], sizes = [16, 4], strides = [1, 1]} : vector<18x4xf32> to vector<16x4xf32>
    %361 = vector.broadcast %14 : vector<16x1xf32> to vector<16x4xf32>
    %362 = arith.addf %360, %361 : vector<16x4xf32>
    %363 = vector.extract_strided_slice %359 {offsets = [16, 0], sizes = [2, 4], strides = [1, 1]} : vector<18x4xf32> to vector<2x4xf32>
    %364 = vector.extract_strided_slice %362 {offsets = [0, 0], sizes = [8, 4], strides = [1, 1]} : vector<16x4xf32> to vector<8x4xf32>
    %cst_106 = arith.constant dense<0xFF800000> : vector<4xf32>
    %365 = vector.multi_reduction <maximumf>, %364, %cst_106 [0] : vector<8x4xf32> to vector<4xf32>
    %366 = vector.shape_cast %365 : vector<4xf32> to vector<1x4xf32>
    %367 = vector.extract_strided_slice %362 {offsets = [8, 0], sizes = [8, 4], strides = [1, 1]} : vector<16x4xf32> to vector<8x4xf32>
    %cst_107 = arith.constant dense<0xFF800000> : vector<4xf32>
    %368 = vector.multi_reduction <maximumf>, %367, %cst_107 [0] : vector<8x4xf32> to vector<4xf32>
    %369 = vector.shape_cast %368 : vector<4xf32> to vector<1x4xf32>
    %370 = tpu.concatenate %366, %369 in 0 : vector<1x4xf32>, vector<1x4xf32> -> vector<2x4xf32>
    %371 = arith.maximumf %370, %363 : vector<2x4xf32>
    %372 = vector.extract_strided_slice %371 {offsets = [0, 0], sizes = [1, 4], strides = [1, 1]} : vector<2x4xf32> to vector<1x4xf32>
    %373 = vector.shape_cast %372 : vector<1x4xf32> to vector<1x4xf32>
    %374 = vector.broadcast %373 : vector<1x4xf32> to vector<8x4xf32>
    %375 = vector.extract_strided_slice %371 {offsets = [1, 0], sizes = [1, 4], strides = [1, 1]} : vector<2x4xf32> to vector<1x4xf32>
    %376 = vector.shape_cast %375 : vector<1x4xf32> to vector<1x4xf32>
    %377 = vector.broadcast %376 : vector<1x4xf32> to vector<8x4xf32>
    %378 = tpu.concatenate %374, %377 in 0 : vector<8x4xf32>, vector<8x4xf32> -> vector<16x4xf32>
    %379 = arith.subf %362, %378 : vector<16x4xf32>
    %380 = math.exp %379 : vector<16x4xf32>
    %381 = arith.subf %363, %371 : vector<2x4xf32>
    %382 = math.exp %381 : vector<2x4xf32>
    %383 = tpu.concatenate %380, %382 in 0 : vector<16x4xf32>, vector<2x4xf32> -> vector<18x4xf32>
    %cst_108 = arith.constant dense<0.000000e+00> : vector<18x32xf32>
    %384 = tpu.matmul %383, %2, %cst_108 {dimension_numbers = #tpu.dot_dimension_numbers<[1], [0], [0], [1], [0, 0, 1, 1], [], []>} : vector<18x4xf32>, vector<4x32xf32>, vector<18x32xf32> -> vector<18x32xf32>
    %385 = vector.extract_strided_slice %384 {offsets = [0, 0], sizes = [16, 32], strides = [1, 1]} : vector<18x32xf32> to vector<16x32xf32>
    %386 = arith.mulf %385, %346 : vector<16x32xf32>
    %387 = tpu.concatenate %386, %380 in 1 : vector<16x32xf32>, vector<16x4xf32> -> vector<16x36xf32>
    %cst_109 = arith.constant dense<0.000000e+00> : vector<2x36xf32>
    %388 = tpu.matmul %0, %387, %cst_109 {dimension_numbers = #tpu.dot_dimension_numbers<[1], [0], [0], [1], [0, 0, 1, 1], [], []>} : vector<2x16xf32>, vector<16x36xf32>, vector<2x36xf32> -> vector<2x36xf32>
    %389 = vector.extract_strided_slice %388 {offsets = [0, 0], sizes = [2, 32], strides = [1, 1]} : vector<2x36xf32> to vector<2x32xf32>
    %390 = vector.extract_strided_slice %388 {offsets = [0, 32], sizes = [2, 4], strides = [1, 1]} : vector<2x36xf32> to vector<2x4xf32>
    %391 = arith.addf %390, %382 : vector<2x4xf32>
    %cst_110 = arith.constant dense<0.000000e+00> : vector<2x32xf32>
    %392 = tpu.matmul %391, %2, %cst_110 {dimension_numbers = #tpu.dot_dimension_numbers<[1], [0], [0], [1], [0, 0, 1, 1], [], []>} : vector<2x4xf32>, vector<4x32xf32>, vector<2x32xf32> -> vector<2x32xf32>
    %393 = tpu.reciprocal %392 : vector<2x32xf32> -> vector<2x32xf32>
    %394 = vector.extract_strided_slice %384 {offsets = [16, 0], sizes = [2, 32], strides = [1, 1]} : vector<18x32xf32> to vector<2x32xf32>
    %395 = arith.mulf %394, %348 : vector<2x32xf32>
    %396 = arith.addf %389, %395 : vector<2x32xf32>
    %397 = arith.mulf %396, %393 : vector<2x32xf32>
    %c32_111 = arith.constant 32 : index
    %c640_112 = arith.constant 640 : index
    %398 = vector.load %arg1[%c32_111, %c640_112] : memref<64x896xf32, #tpu.memory_space<vmem>>, vector<32x24xf32>
    %cst_113 = arith.constant dense<0.000000e+00> : vector<2x24xf32>
    %399 = tpu.matmul %397, %398, %cst_113 {dimension_numbers = #tpu.dot_dimension_numbers<[1], [0], [0], [1], [0, 0, 1, 1], [], []>} : vector<2x32xf32>, vector<32x24xf32>, vector<2x24xf32> -> vector<2x24xf32>
    %c41 = arith.constant 41 : index
    %c768_114 = arith.constant 768 : index
    %400 = vector.load %arg1[%c41, %c768_114] : memref<64x896xf32, #tpu.memory_space<vmem>>, vector<1x24xf32>
    %401 = vector.broadcast %400 : vector<1x24xf32> to vector<2x24xf32>
    %402 = arith.addf %399, %401 : vector<2x24xf32>
    %cst_115 = arith.constant 0.000000e+00 : f32
    %403 = vector.broadcast %cst_115 : f32 to vector<2x24xf32>
    %404 = arith.cmpf oge, %402, %403 : vector<2x24xf32>
    %cst_116 = arith.constant 0.00999999977 : f32
    %405 = vector.broadcast %cst_116 : f32 to vector<2x24xf32>
    %406 = arith.mulf %405, %402 : vector<2x24xf32>
    %407 = arith.select %404, %402, %406 : vector<2x24xi1>, vector<2x24xf32>
    %408 = vector.broadcast %12 : vector<16x1xf32> to vector<16x24xf32>
    %409 = arith.mulf %337, %408 : vector<16x24xf32>
    %cst_117 = arith.constant dense<0.000000e+00> : vector<2x24xf32>
    %410 = tpu.matmul %10, %409, %cst_117 {dimension_numbers = #tpu.dot_dimension_numbers<[1], [0], [0], [1], [0, 0, 1, 1], [], []>} : vector<2x16xf32>, vector<16x24xf32>, vector<2x24xf32> -> vector<2x24xf32>
    %411 = tpu.concatenate %407, %410 in 1 : vector<2x24xf32>, vector<2x24xf32> -> vector<2x48xf32>
    %cst_118 = arith.constant dense<0.000000e+00> : vector<2x96xf32>
    %412 = tpu.matmul %411, %4, %cst_118 {dimension_numbers = #tpu.dot_dimension_numbers<[1], [0], [0], [1], [0, 0, 1, 1], [], []>} : vector<2x48xf32>, vector<48x96xf32>, vector<2x96xf32> -> vector<2x96xf32>
    %413 = vector.broadcast %6 : vector<1x96xf32> to vector<2x96xf32>
    %414 = arith.addf %412, %413 : vector<2x96xf32>
    %cst_119 = arith.constant 0.000000e+00 : f32
    %415 = vector.broadcast %cst_119 : f32 to vector<2x96xf32>
    %416 = arith.maximumf %414, %415 : vector<2x96xf32>
    %cst_120 = arith.constant dense<0.000000e+00> : vector<2x48xf32>
    %417 = tpu.matmul %416, %5, %cst_120 {dimension_numbers = #tpu.dot_dimension_numbers<[1], [0], [0], [1], [0, 0, 1, 1], [], []>} : vector<2x96xf32>, vector<96x48xf32>, vector<2x48xf32> -> vector<2x48xf32>
    %418 = vector.broadcast %7 : vector<1x48xf32> to vector<2x48xf32>
    %419 = arith.addf %417, %418 : vector<2x48xf32>
    %c0_121 = arith.constant 0 : index
    %c0_122 = arith.constant 0 : index
    %420 = vector.load %arg3[%c0_121, %c0_122] : memref<2x48xf32, #tpu.memory_space<vmem>>, vector<2x48xf32>
    tpu.vector_store %arg3[%c0_121, %c0_122], %419 {strides = array<i32>} : memref<2x48xf32, #tpu.memory_space<vmem>>, vector<2x48xf32>,
    return
  }
}

</mosaic_0001>

<bundles_post_ra>
// kernel: forward.1
= control target key start
LH: loop header
LB: loop body
LE: loop exit
PB: predicated region body
PF: predicated region fallthrough
CT: control target
= control target key end

     0   :  { %vm132_vm0 = vcmask 195584   ;;  %v4112_v2 = vmov 0.0   ;;  %vm4113_vm1 = vmmov 0   ;;  %vm53_vm2 = vcmask 130048   ;;  %s4114_s23 = smov 96   ;;  %s4116_s13 = smov 64   ;;  %s4910_s1 = inlined_call_operand.vmem [shape: f32[64,896], index: 1, kind: input, shape index: {}]   ;;  %s4911_s0 = inlined_call_operand.vmem [shape: f32[18,33], index: 0, kind: input, shape index: {}]   ;;  %s4912_s2 = inlined_call_operand.vmem [shape: f32[248,128], index: 2, kind: input, shape index: {}]   ;;  %s4913_s3 = inlined_call_operand.vmem [shape: f32[2,48], index: 3, kind: output, shape index: {}]  }
   0x1   :  { %v130_v0 = vld [vmem:[%s4910_s1 + $0x70] sm:$0xff]  ;;  %v129_v1 = vld [vmem:[%s4910_s1 + $0x38] sm:$0xff]  ;;  %3642 = vmatprep.subr.mxu0 %v4112_v2  ;;  %3646 = vmatprep.mubr.msk.f32.mxu0 %vm4113_vm1, %v4112_v2  ;;  %v4151_v3 = vld [vmem:[%s4911_s0] sm:$0xff]  ;;  %vm221_vm3 = vcmask 261120   ;;  %vm442_vm4 = vcmask 146432   ;;  %vm461_vm5 = vcmask 1041408  }
   0x2   :  { %3649 = vmatprep.subr.mxu1 %v130_v0  ;;  %v128_v4 = vld [vmem:[%s4910_s1] sm:$0xff]  ;;  %3655 = vmatprep.mubr.msk.f32.mxu1 %vm132_vm0, %v4151_v3  ;;  %v4161_v5 = vld [vmem:[%s4911_s0 + $0x8] sm:$0xff]  ;;  %v219_v7 = vld [vmem:[%s4910_s1 + $0xb0] sm:$0xff]  ;;  %vm767_vm6 = vcmask 1043456   ;;  %vm742_vm7 = vcmask 31744   ;;  %vm1272_vm10 = vcmask 1040384  }
   0x3   :  { %3650 = vmatpush3.msra.mxu1 %v130_v0  ;;  %3643 = vmatpush3.msra.mxu0 %v4161_v5  ;;  %v4167_v6 = vld [vmem:[%s4912_s2] sm:$0x3]  ;;  %v218_v8 = vld [vmem:[%s4910_s1 + $0x78] sm:$0xff]  ;;  %v216_v10 = vld [vmem:[%s4910_s1 + $0x8] sm:$0xff]  ;;  %s4117_s14 = smov 32   ;;  %s4118_s11 = smov 24  }
   0x4   :  { %3651 = vmatprep.subr.mxu1 %v129_v1  ;;  %3644 = vmatprep.subr.mxu0 %v4112_v2  ;;  %v217_v9 = vld [vmem:[%s4910_s1 + $0x40] sm:$0xff]  ;;  %v131_v11 = vld [vmem:[%s4910_s1 + $0x30] ss:$0 sm:$0xff]  ;;  %v220_v21 = vld [vmem:[%s4910_s1 + $0x31] ss:$0 sm:$0xff]  ;;  %vm3197_vm15 = vcmask 392192  }
   0x5   :  { %3652 = vmatpush3.msra.mxu1 %v129_v1  ;;  %3645 = vmatpush3.msra.mxu0 %v4151_v3  ;;  %v340_v39 = vld [vmem:[%s4910_s1 + $0x80] sm:$0xff]  ;;  %v339_v40 = vld [vmem:[%s4910_s1 + $0x48] sm:$0xff]  ;;  %v338_v41 = vld [vmem:[%s4910_s1 + $0x10] sm:$0xff] }
   0x6   :  { %3653 = vmatprep.subr.mxu1 %v128_v4  ;;  %3647 = vmatmul.mubr.msk.f32.vlgmr.msra.gmra.mxu0 %vm53_vm2, %v4167_v6  ;;  %v305_v49 = vld [vmem:[%s4910_s1 + $0x32] ss:$0 sm:$0xff]  ;;  %v306_v51 = vld [vmem:[%s4910_s1 + $0x33] ss:$0 sm:$0xff]  ;;  %v341_v62 = vld [vmem:[%s4910_s1 + $0x36] ss:$0 sm:$0xff] }
   0x7   :  { %3654 = vmatpush3.msra.mxu1 %v128_v4  ;;  %3658 = vmatprep.subr.mxu0 %v219_v7  ;;  %v4237_v61 = vld [vmem:[%s4912_s2 + $0x30] sm:$0xff] }
   0x8   :  { %3656 = vmatmul.mubr.msk.f32.vlgmr.msra.gmra.mxu1 %vm132_vm0, %v4161_v5  ;;  %3669 = vmatprep.subr.mxu1 %v4112_v2 }
   0x9   :  { %3675 = vmatprep.mubr.msk.f32.mxu1 %vm4113_vm1, %v4112_v2  ;;  %3659 = vmatpush3.msra.mxu0 %v219_v7 }
   0xa   :  { %3660 = vmatprep.subr.mxu0 %v218_v8  ;;  %3670 = vmatpush3.msra.mxu1 %v340_v39 }
   0xb   :  { %3661 = vmatpush3.msra.mxu0 %v218_v8  ;;  %3671 = vmatprep.subr.mxu1 %v4112_v2 }
   0xc   :  { %3662 = vmatprep.subr.mxu0 %v217_v9  ;;  %3672 = vmatpush3.msra.mxu1 %v339_v40 }
   0xd   :  { %3663 = vmatpush3.msra.mxu0 %v217_v9  ;;  %3673 = vmatprep.subr.mxu1 %v4112_v2 }
   0xe   :  { %3664 = vmatprep.subr.mxu0 %v216_v10  ;;  %3674 = vmatpush3.msra.mxu1 %v338_v41 }
   0xf   :  { %3665 = vmatpush3.msra.mxu0 %v216_v10  ;;  %v4256_v10 = vld [vmem:[%s4912_s2 + $0x20] sm:$0xff] }
  0x10   :  { %3699 = vmatprep.subr.mxu1 %v4256_v10 }
  0xc6   :  { %v4193_v12 = vpop.f32.mrf.mxu0 }
  0xc7   :  { %v4230_v58 = vmul.f32 0.125, %v4193_v12 }
  0xc8   :  { %v3657_v13 = vpop.f32.mrf.mxu1  ;;  %v3648_v14 = vpop.f32.mrf.mxu0 }
  0xc9   :  { %v211_v15 = vadd.f32 %v3657_v13, %v131_v11  ;;  %v21_v14 = vld [vmem:[%s4912_s2 + $0x38] sm:$0xff] }
  0xca   :  { %v205_v16 = vpop.f32.mrf.mxu1 }
  0xcb   :  { %v206_v17 = vadd.f32 %v205_v16, %v131_v11  ;;  %v215_v19 = vmax.f32 %v211_v15, 0.0  ;;  %v22_v15 = vld [vmem:[%s4912_s2 + $0x40] sm:$0xff]  ;;  %v23_v16 = vld [vmem:[%s4912_s2 + $0x48] sm:$0xff] }
  0xcd   :  { %v214_v18 = vmax.f32 %v206_v17, 0.0  ;;  %v24_v17 = vld [vmem:[%s4912_s2 + $0x50] sm:$0xff] }
  0xcf   :  { %3666 = vmatprep.mubr.msk.f32.mxu0 %vm221_vm3, %v214_v18  ;;  %v25_v18 = vld [vmem:[%s4912_s2 + $0x58] sm:$0xff] }
  0xd0   :  { %3667 = vmatmul.mubr.msk.f32.vlgmr.msra.gmra.mxu0 %vm221_vm3, %v215_v19  ;;  %v4287_v19 = vld [vmem:[%s4912_s2 + $0x18] sm:$0xff] }
  0xd1   :  { %3690 = vmatprep.mubr.msk.f32.mxu0 %vm442_vm4, %v4237_v61 }
 0x190   :  { %v3668_v20 = vpop.f32.mrf.mxu0 }
 0x191   :  { %v300_v23 = vadd.f32 %v3668_v20, %v220_v21  ;;  %v4294_v20 = vld [vmem:[%s4912_s2 + $0x10] sm:$0xff] }
 0x192   :  { %v294_v22 = vpop.f32.mrf.mxu0 }
 0x193   :  { %v295_v24 = vadd.f32 %v294_v22, %v220_v21  ;;  %v304_v27 = vadd.f32 %v300_v23, %v4161_v5  ;;  %v4301_v21 = vld [vmem:[%s4912_s2 + $0x8] sm:$0xff] }
 0x195   :  { %v303_v25 = vadd.f32 %v295_v24, %v4151_v3  ;;  %v310_v28 = vsel %vm132_vm0, %v304_v27, 0.0 }
 0x197   :  { %v307_v26 = vsel %vm132_vm0, %v303_v25, 0.0 }
 0x198   :  { %308 = vadd.xlane.f32.xlu0 %v307_v26 }
 0x19c   :  { %311 = vadd.xlane.f32.xlu0 %v310_v28 }
 0x221   :  { %v309_v29 = vpop.xlane.xlu0 %308 }
 0x222   :  { %v314_v30 = vmul.f32 0.041666668, %v309_v29 }
 0x224   :  { %v316_v31 = vsub.f32 %v303_v25, %v314_v30 }
 0x225   :  { %v312_v32 = vpop.xlane.xlu0 %311 }
 0x226   :  { %v315_v33 = vmul.f32 0.041666668, %v312_v32  ;;  %v318_v34 = vmul.f32 %v316_v31, %v316_v31 }
 0x228   :  { %v317_v35 = vsub.f32 %v304_v27, %v315_v33  ;;  %v320_v36 = vsel %vm132_vm0, %v318_v34, 0.0 }
 0x229   :  { %321 = vadd.xlane.f32.xlu1 %v320_v36  ;;  %v4341_v36 = vld [vmem:[%s4912_s2 + $0x28] sm:$0xf] }
 0x22a   :  { %v319_v37 = vmul.f32 %v317_v35, %v317_v35 }
 0x22c   :  { %v323_v38 = vsel %vm132_vm0, %v319_v37, 0.0 }
 0x22d   :  { %324 = vadd.xlane.f32.xlu1 %v323_v38 }
 0x2b2   :  { %v322_v42 = vpop.xlane.xlu1 %321 }
 0x2b3   :  { %v326_v43 = vmul.f32 0.041666668, %v322_v42 }
 0x2b5   :  { %v328_v44 = vadd.f32 1e-05, %v326_v43 }
 0x2b6   :  { %v325_v45 = vpop.xlane.xlu1 %324 }
 0x2b7   :  { %4029 = vrsqrt.f32 %v328_v44  ;;  %v327_v46 = vmul.f32 0.041666668, %v325_v45 }
 0x2b9   :  { %v329_v47 = vadd.f32 1e-05, %v327_v46 }
 0x2bb   :  { %4031 = vrsqrt.f32 %v329_v47 }
 0x2c4   :  { %v4030_v48 = vpop.eup %4029 }
 0x2c5   :  { %v332_v50 = vmul.f32 %v4030_v48, %v316_v31 }
 0x2c7   :  { %v334_v52 = vmul.f32 %v332_v50, %v305_v49 }
 0x2c8   :  { %v4032_v53 = vpop.eup %4031 }
 0x2c9   :  { %v336_v54 = vadd.f32 %v334_v52, %v306_v51  ;;  %v333_v55 = vmul.f32 %v4032_v53, %v317_v35 }
 0x2cb   :  { %3676 = vmatmul.mubr.msk.f32.vlgmr.msra.gmra.mxu1 %vm132_vm0, %v336_v54  ;;  %v335_v56 = vmul.f32 %v333_v55, %v305_v49 }
 0x2cc   :  { %3678 = vmatprep.mubr.msk.f32.mxu1 %vm4113_vm1, %v4112_v2  ;;  %3700 = vmatpush3.msra.mxu1 %v4256_v10 }
 0x2cd   :  { %v337_v57 = vadd.f32 %v335_v56, %v306_v51  ;;  %3701 = vmatprep.subr.mxu1 %v4287_v19 }
 0x2ce   :  { %3702 = vmatpush3.msra.mxu1 %v4287_v19 }
 0x2cf   :  { %3679 = vmatmul.mubr.msk.f32.gmra.mxu1 %vm132_vm0, %v337_v57  ;;  %3703 = vmatprep.subr.mxu1 %v4294_v20 }
 0x2d0   :  { %3681 = vmatprep.mubr.msk.f32.mxu1 %vm4113_vm1, %v4112_v2  ;;  %3704 = vmatpush3.msra.mxu1 %v4294_v20 }
 0x2d1   :  { %3705 = vmatprep.subr.mxu1 %v4301_v21 }
 0x2d2   :  { %3706 = vmatpush3.msra.mxu1 %v4301_v21 }
 0x2d3   :  { %3682 = vmatmul.mubr.msk.f32.gmra.mxu1 %vm132_vm0, %v4230_v58  ;;  %3759 = vmatprep.subr.mxu1 %v4112_v2 }
 0x38b   :  { %v417_v59 = vpop.f32.mrf.mxu1 }
 0x38c   :  { %v4248_v7 = vadd.f32 %v417_v59, %v341_v62 }
 0x38d   :  { %v3677_v60 = vpop.f32.mrf.mxu1 }
 0x38f   :  { %v422_v63 = vpop.f32.mrf.mxu1 }
 0x390   :  { %v4244_v0 = vadd.f32 %v422_v63, %v341_v62 }
 0x391   :  { %v3680_v1 = vpop.f32.mrf.mxu1 }
 0x392   :  { %436 = vrot.lane.b32.xlu1 %v4244_v0, %s4114_s23 }
 0x393   :  { %v427_v4 = vpop.f32.mrf.mxu1 }
 0x394   :  { %v428_v8 = vadd.f32 %v427_v4, %v341_v62 }
 0x395   :  { %v3683_v9 = vpop.f32.mrf.mxu1 }
 0x396   :  { %434 = vrot.lane.b32.xlu1 %v4248_v7, %s4114_s23  ;;  %438 = vrot.lane.b32.xlu0 %v428_v8, %s4114_s23 }
 0x404   :  { %v437_v11 = vpop.permute.xlu1 %436 }
 0x405   :  { %v562_v29 = vmul.f32 %v437_v11, %v4244_v0 }
 0x408   :  { %v435_v12 = vpop.permute.xlu1 %434  ;;  %v439_v13 = vpop.permute.xlu0 %438 }
 0x409   :  { %886 = vrot.lane.b32.xlu0 %v435_v12, %s4114_s23  ;;  %3684 = vmatprep.subr.msk.mxu0 %vm461_vm5, %v439_v13  ;;  %v561_v27 = vmul.f32 %v435_v12, %v4248_v7 }
 0x40a   :  { %3685 = vmatpush3.msk.msra.mxu0 %vm461_vm5, %v439_v13 }
 0x40b   :  { %3686 = vmatprep.subr.mxu0 %v437_v11 }
 0x40c   :  { %3687 = vmatpush3.msra.mxu0 %v437_v11 }
 0x40d   :  { %888 = vrot.lane.b32.xlu0 %v437_v11, %s4114_s23  ;;  %3688 = vmatprep.subr.mxu0 %v435_v12 }
 0x40e   :  { %3689 = vmatpush3.msra.mxu0 %v435_v12 }
 0x40f   :  { %3691 = vmatmul.mubr.msk.f32.vlgmr.msra.gmra.mxu0 %vm442_vm4, %v21_v14  ;;  %3719 = vmatprep.subr.msk.mxu0 %vm767_vm6, %v4341_v36 }
 0x410   :  { %3693 = vmatprep.mubr.msk.f32.mxu0 %vm442_vm4, %v22_v15  ;;  %3720 = vmatpush3.msk.msra.mxu0 %vm767_vm6, %v4341_v36 }
 0x413   :  { %3694 = vmatmul.mubr.msk.f32.gmra.mxu0 %vm442_vm4, %v23_v16 }
 0x414   :  { %3696 = vmatprep.mubr.msk.f32.mxu0 %vm442_vm4, %v24_v17 }
 0x417   :  { %3697 = vmatmul.mubr.msk.f32.gmra.mxu0 %vm442_vm4, %v25_v18 }
 0x4cf   :  { %v3692_v22 = vpop.f32.mrf.mxu0 }
 0x4d0   :  { %884 = vrot.lane.b32.xlu1 %v3692_v22, %s4114_s23  ;;  %v560_v25 = vmul.f32 %v3692_v22, %v4244_v0 }
 0x4d1   :  { %v530_v23 = vpop.f32.mrf.mxu0 }
 0x4d2   :  { %v559_v24 = vmul.f32 %v530_v23, %v4248_v7 }
 0x4d3   :  { %v3695_v26 = vpop.f32.mrf.mxu0 }
 0x4d4   :  { %882 = vrot.lane.b32.xlu1 %v530_v23, %s4114_s23  ;;  %3707 = vmatprep.mubr.msk.f32.mxu1 %vm221_vm3, %v559_v24  ;;  %v564_v33 = vmul.f32 %v3695_v26, %v4244_v0 }
 0x4d5   :  { %v540_v28 = vpop.f32.mrf.mxu0  ;;  %3708 = vmatmul.mubr.msk.f32.vlgmr.msra.gmra.mxu1 %vm221_vm3, %v560_v25  ;;  %892 = vrot.lane.b32.xlu0 %v3695_v26, %s4114_s23 }
 0x4d6   :  { %3710 = vmatprep.mubr.msk.f32.mxu1 %vm221_vm3, %v561_v27  ;;  %3760 = vmatpush3.msra.mxu1 %v4256_v10  ;;  %v563_v31 = vmul.f32 %v540_v28, %v4248_v7 }
 0x4d7   :  { %v3698_v30 = vpop.f32.mrf.mxu0  ;;  %3761 = vmatprep.subr.mxu1 %v4112_v2 }
 0x4d8   :  { %890 = vrot.lane.b32.xlu1 %v540_v28, %s4114_s23  ;;  %3762 = vmatpush3.msra.mxu1 %v4287_v19  ;;  %v566_v35 = vmul.f32 %v3698_v30, %v4244_v0 }
 0x4d9   :  { %v550_v32 = vpop.f32.mrf.mxu0  ;;  %3711 = vmatmul.mubr.msk.f32.gmra.mxu1 %vm221_vm3, %v562_v29  ;;  %896 = vrot.lane.b32.xlu0 %v3698_v30, %s4114_s23 }
 0x4da   :  { %3713 = vmatprep.mubr.msk.f32.mxu1 %vm221_vm3, %v563_v31  ;;  %3763 = vmatprep.subr.mxu1 %v4112_v2  ;;  %v565_v34 = vmul.f32 %v550_v32, %v4248_v7 }
 0x4db   :  { %3764 = vmatpush3.msra.mxu1 %v4294_v20 }
 0x4dc   :  { %894 = vrot.lane.b32.xlu1 %v550_v32, %s4114_s23  ;;  %3765 = vmatprep.subr.mxu1 %v4112_v2 }
 0x4dd   :  { %3714 = vmatmul.mubr.msk.f32.gmra.mxu1 %vm221_vm3, %v564_v33 }
 0x4de   :  { %3716 = vmatprep.mubr.msk.f32.mxu1 %vm221_vm3, %v565_v34  ;;  %3766 = vmatpush3.msra.mxu1 %v4301_v21 }
 0x4df   :  { %3787 = vmatprep.subr.mxu1 %v4112_v2 }
 0x4e1   :  { %3717 = vmatmul.mubr.msk.f32.gmra.mxu1 %vm221_vm3, %v566_v35 }
 0x4e2   :  { %3767 = vmatprep.mubr.msk.f32.mxu1 %vm4113_vm1, %v4112_v2 }
 0x595   :  { %v3709_v37 = vpop.f32.mrf.mxu1 }
 0x597   :  { %v657_v38 = vpop.f32.mrf.mxu1 }
 0x599   :  { %v3712_v39 = vpop.f32.mrf.mxu1 }
 0x59a   :  { %v697_v44 = vmax.f32 %v3709_v37, %v3712_v39 }
 0x59b   :  { %v667_v40 = vpop.f32.mrf.mxu1 }
 0x59c   :  { %v696_v49 = vmax.f32 %v657_v38, %v667_v40 }
 0x59d   :  { %v3715_v41 = vpop.f32.mrf.mxu1 }
 0x59f   :  { %v677_v42 = vpop.f32.mrf.mxu1 }
 0x5a1   :  { %v3718_v43 = vpop.f32.mrf.mxu1 }
 0x5a2   :  { %v699_v45 = vmax.f32 %v3715_v41, %v3718_v43 }
 0x5a3   :  { %v687_v46 = vpop.f32.mrf.mxu1 }
 0x5a4   :  { %v701_v47 = vmax.f32 %v697_v44, %v699_v45  ;;  %v698_v48 = vmax.f32 %v677_v42, %v687_v46 }
 0x5a6   :  { %v703_v50 = vsub.f32 %v3709_v37, %v701_v47  ;;  %v705_v51 = vsub.f32 %v3712_v39, %v701_v47  ;;  %v707_v52 = vsub.f32 %v3715_v41, %v701_v47  ;;  %v700_v53 = vmax.f32 %v696_v49, %v698_v48  ;;  %v922_v39 = vld [vmem:[%s4910_s1 + $0x88] sm:$0xff]  ;;  %v920_v41 = vld [vmem:[%s4910_s1 + $0x18] sm:$0xff] }
 0x5a7   :  { %v709_v54 = vsub.f32 %v3718_v43, %v701_v47  ;;  %v887_v43 = vpop.permute.xlu0 %886 }
 0x5a8   :  { %v712_v55 = vmul.f32 1.442695, %v703_v50  ;;  %v716_v56 = vmul.f32 1.442695, %v705_v51  ;;  %v720_v57 = vmul.f32 1.442695, %v707_v52  ;;  %v702_v59 = vsub.f32 %v657_v38, %v700_v53 }
 0x5a9   :  { %v704_v60 = vsub.f32 %v667_v40, %v700_v53  ;;  %v706_v62 = vsub.f32 %v677_v42, %v700_v53  ;;  %v708_v63 = vsub.f32 %v687_v46, %v700_v53  ;;  %v724_v4 = vmul.f32 1.442695, %v709_v54  ;;  %v923_v38 = vld [vmem:[%s4910_s1 + $0xc0] sm:$0xff]  ;;  %v921_v40 = vld [vmem:[%s4910_s1 + $0x50] sm:$0xff]  ;;  %v885_v42 = vpop.permute.xlu1 %884 }
 0x5aa   :  { %4033 = vpow2.f32 %v712_v55  ;;  %v710_v0 = vmul.f32 1.442695, %v702_v59  ;;  %3733 = vmatprep.subr.mxu0 %v923_v38 }
 0x5ab   :  { %4035 = vpow2.f32 %v716_v56  ;;  %v714_v1 = vmul.f32 1.442695, %v704_v60  ;;  %v718_v7 = vmul.f32 1.442695, %v706_v62  ;;  %v722_v8 = vmul.f32 1.442695, %v708_v63  ;;  %v889_v47 = vpop.permute.xlu0 %888 }
 0x5ac   :  { %4037 = vpow2.f32 %v720_v57 }
 0x5ad   :  { %4039 = vpow2.f32 %v710_v0  ;;  %v883_v45 = vpop.permute.xlu1 %882 }
 0x5ae   :  { %4041 = vpow2.f32 %v714_v1 }
 0x5af   :  { %4043 = vpow2.f32 %v724_v4  ;;  %v893_v50 = vpop.permute.xlu0 %892 }
 0x5b0   :  { %4045 = vpow2.f32 %v718_v7 }
 0x5b1   :  { %4047 = vpow2.f32 %v722_v8  ;;  %v891_v51 = vpop.permute.xlu1 %890 }
 0x5b3   :  { %v897_v63 = vpop.permute.xlu0 %896 }
 0x5b5   :  { %v895_v1 = vpop.permute.xlu1 %894 }
 0x5b7   :  { %v4034_v9 = vpop.eup %4033 }
 0x5b8   :  { %v4036_v11 = vpop.eup %4035 }
 0x5b9   :  { %v727_v12 = vadd.f32 %v4036_v11, %v4034_v9  ;;  %v4038_v13 = vpop.eup %4037 }
 0x5ba   :  { %v4040_v14 = vpop.eup %4039 }
 0x5bb   :  { %v729_v15 = vadd.f32 %v4038_v13, %v727_v12  ;;  %v4042_v16 = vpop.eup %4041 }
 0x5bc   :  { %v4044_v17 = vpop.eup %4043  ;;  %v726_v18 = vadd.f32 %v4042_v16, %v4040_v14 }
 0x5bd   :  { %v4046_v22 = vpop.eup %4045  ;;  %v731_v23 = vadd.f32 %v4044_v17, %v729_v15  ;;  %v924_v15 = vld [vmem:[%s4910_s1 + $0x37] ss:$0 sm:$0xff] }
 0x5be   :  { %v728_v24 = vadd.f32 %v4046_v22, %v726_v18  ;;  %v4048_v25 = vpop.eup %4047 }
 0x5bf   :  { %4049 = vrcp.f32 %v731_v23 }
 0x5c0   :  { %v730_v26 = vadd.f32 %v4048_v25, %v728_v24 }
 0x5c2   :  { %4051 = vrcp.f32 %v730_v26 }
 0x5cc   :  { %v4050_v27 = vpop.eup %4049 }
 0x5cd   :  { %v735_v30 = vmul.f32 %v4050_v27, %v4034_v9  ;;  %v737_v32 = vmul.f32 %v4050_v27, %v4036_v11  ;;  %v739_v34 = vmul.f32 %v4050_v27, %v4038_v13  ;;  %v741_v37 = vmul.f32 %v4050_v27, %v4044_v17 }
 0x5cf   :  { %v4052_v28 = vpop.eup %4051 }
 0x5d0   :  { %v734_v29 = vmul.f32 %v4052_v28, %v4040_v14  ;;  %v736_v31 = vmul.f32 %v4052_v28, %v4042_v16  ;;  %v738_v33 = vmul.f32 %v4052_v28, %v4046_v22  ;;  %v740_v35 = vmul.f32 %v4052_v28, %v4048_v25 }
 0x5d2   :  { %3721 = vmatprep.mubr.msk.f32.mxu0 %vm742_vm7, %v734_v29 }
 0x5d3   :  { %3722 = vmatmul.mubr.msk.f32.vlgmr.msra.gmra.mxu0 %vm742_vm7, %v735_v30 }
 0x5d4   :  { %3724 = vmatprep.mubr.msk.f32.mxu0 %vm742_vm7, %v736_v31  ;;  %3734 = vmatpush3.msra.mxu0 %v923_v38  ;;  %v1044_v38 = vld [vmem:[%s4910_s1 + $0x20] sm:$0xff] }
 0x5d5   :  { %3735 = vmatprep.subr.mxu0 %v922_v39 }
 0x5d6   :  { %3736 = vmatpush3.msra.mxu0 %v922_v39 }
 0x5d7   :  { %3725 = vmatmul.mubr.msk.f32.gmra.mxu0 %vm742_vm7, %v737_v32  ;;  %3737 = vmatprep.subr.mxu0 %v921_v40 }
 0x5d8   :  { %3727 = vmatprep.mubr.msk.f32.mxu0 %vm742_vm7, %v738_v33  ;;  %3738 = vmatpush3.msra.mxu0 %v921_v40 }
 0x5d9   :  { %3739 = vmatprep.subr.mxu0 %v920_v41 }
 0x5da   :  { %3740 = vmatpush3.msra.mxu0 %v920_v41 }
 0x5db   :  { %3728 = vmatmul.mubr.msk.f32.gmra.mxu0 %vm742_vm7, %v739_v34  ;;  %3744 = vmatprep.subr.mxu0 %v4112_v2 }
 0x5dc   :  { %3730 = vmatprep.mubr.msk.f32.mxu0 %vm742_vm7, %v740_v35  ;;  %v1046_v35 = vld [vmem:[%s4910_s1 + $0x90] sm:$0xff] }
 0x5df   :  { %3731 = vmatmul.mubr.msk.f32.gmra.mxu0 %vm742_vm7, %v741_v37  ;;  %v1045_v37 = vld [vmem:[%s4910_s1 + $0x58] sm:$0xff] }
 0x693   :  { %v3723_v44 = vpop.f32.mrf.mxu0 }
 0x694   :  { %v907_v59 = vmul.f32 %v3723_v44, %v885_v42 }
 0x695   :  { %v837_v46 = vpop.f32.mrf.mxu0 }
 0x696   :  { %v906_v56 = vmul.f32 %v883_v45, %v837_v46  ;;  %v1006_v46 = vld [vmem:[%s4910_s1 + $0x34] ss:$0 sm:$0xff] }
 0x697   :  { %v3726_v48 = vpop.f32.mrf.mxu0 }
 0x698   :  { %v909_v54 = vmul.f32 %v3726_v48, %v889_v47  ;;  %v1007_v48 = vld [vmem:[%s4910_s1 + $0x35] ss:$0 sm:$0xff] }
 0x699   :  { %v847_v49 = vpop.f32.mrf.mxu0 }
 0x69a   :  { %v908_v53 = vmul.f32 %v887_v43, %v847_v49  ;;  %v915_v4 = vadd.f32 %v909_v54, %v907_v59 }
 0x69b   :  { %v3729_v52 = vpop.f32.mrf.mxu0 }
 0x69c   :  { %v911_v60 = vmul.f32 %v3729_v52, %v893_v50  ;;  %v914_v0 = vadd.f32 %v908_v53, %v906_v56 }
 0x69d   :  { %v857_v55 = vpop.f32.mrf.mxu0 }
 0x69e   :  { %v910_v57 = vmul.f32 %v891_v51, %v857_v55  ;;  %v917_v12 = vadd.f32 %v915_v4, %v911_v60  ;;  %v4115_v60 = vmov 32  }
 0x69f   :  { %v3732_v62 = vpop.f32.mrf.mxu0  ;;  %4027 = vset.pattern.permute.xlu1 %v4115_v60  ;;  %4028 = vset.pattern.permute.xlu0 %v4115_v60 }
 0x6a0   :  { %v913_v7 = vmul.f32 %v3732_v62, %v897_v63  ;;  %v916_v9 = vadd.f32 %v914_v0, %v910_v57  ;;  %v1047_v62 = vld [vmem:[%s4910_s1 + $0x68] ss:$0 sm:$0xff] }
 0x6a1   :  { %v867_v8 = vpop.f32.mrf.mxu0 }
 0x6a2   :  { %v912_v11 = vmul.f32 %v895_v1, %v867_v8  ;;  %v919_v14 = vadd.f32 %v917_v12, %v913_v7  ;;  %v51_v12 = vmul.f32 -1e+30, %v4151_v3 }
 0x6a4   :  { %v918_v13 = vadd.f32 %v916_v9, %v912_v11 }
 0x6a6   :  { %3741 = vmatprep.mubr.msk.f32.mxu0 %vm221_vm3, %v918_v13  ;;  %v52_v13 = vmul.f32 -1e+30, %v4161_v5 }
 0x6a7   :  { %3742 = vmatmul.mubr.msk.f32.vlgmr.msra.gmra.mxu0 %vm221_vm3, %v919_v14  ;;  %v1134_v14 = vlaneseq }
 0x6a8   :  { %3750 = vmatprep.mubr.msk.f32.mxu0 %vm4113_vm1, %v4112_v2  ;;  %3745 = vmatpush3.msra.mxu0 %v1046_v35 }
 0x6a9   :  { %3746 = vmatprep.subr.mxu0 %v4112_v2 }
 0x6aa   :  { %3747 = vmatpush3.msra.mxu0 %v1045_v37 }
 0x6ab   :  { %3748 = vmatprep.subr.mxu0 %v4112_v2 }
 0x6ac   :  { %3749 = vmatpush3.msra.mxu0 %v1044_v38 }
 0x6ad   :  { %3776 = vmatprep.subr.mxu0 %v4112_v2 }
 0x767   :  { %v3743_v16 = vpop.f32.mrf.mxu0 }
 0x768   :  { %v1003_v17 = vadd.f32 %v3743_v16, %v924_v15 }
 0x769   :  { %v997_v18 = vpop.f32.mrf.mxu0 }
 0x76a   :  { %v998_v22 = vadd.f32 %v997_v18, %v924_v15  ;;  %v1011_v23 = vsel %vm132_vm0, %v1003_v17, 0.0  ;;  %v1135_v15 = vshrl.u32 %v1134_v14, 7 }
 0x76b   :  { %1012 = vadd.xlane.f32.xlu0 %v1011_v23 }
 0x76c   :  { %v1008_v24 = vsel %vm132_vm0, %v998_v22, 0.0  ;;  %v4429_v16 = vsub.s32 0, %v1135_v15  ;;  %v4433_v18 = vsub.s32 1, %v1135_v15 }
 0x76d   :  { %1009 = vadd.xlane.f32.xlu1 %v1008_v24 }
 0x7f4   :  { %v1013_v25 = vpop.xlane.xlu0 %1012 }
 0x7f5   :  { %v1015_v26 = vmul.f32 0.041666668, %v1013_v25 }
 0x7f6   :  { %v1010_v27 = vpop.xlane.xlu1 %1009 }
 0x7f7   :  { %v1014_v28 = vmul.f32 0.041666668, %v1010_v27  ;;  %v1017_v29 = vsub.f32 %v1003_v17, %v1015_v26 }
 0x7f9   :  { %v1016_v30 = vsub.f32 %v998_v22, %v1014_v28  ;;  %v1019_v33 = vmul.f32 %v1017_v29, %v1017_v29 }
 0x7fb   :  { %v1018_v31 = vmul.f32 %v1016_v30, %v1016_v30  ;;  %v1023_v34 = vsel %vm132_vm0, %v1019_v33, 0.0 }
 0x7fd   :  { %v1020_v32 = vsel %vm132_vm0, %v1018_v31, 0.0 }
 0x7fe   :  { %1021 = vadd.xlane.f32.xlu0 %v1020_v32 }
 0x802   :  { %1024 = vadd.xlane.f32.xlu0 %v1023_v34 }
 0x887   :  { %v1022_v39 = vpop.xlane.xlu0 %1021 }
 0x888   :  { %v1026_v40 = vmul.f32 0.041666668, %v1022_v39 }
 0x88a   :  { %v1028_v41 = vadd.f32 1e-05, %v1026_v40 }
 0x88b   :  { %v1025_v42 = vpop.xlane.xlu0 %1024 }
 0x88c   :  { %4053 = vrsqrt.f32 %v1028_v41  ;;  %v1027_v43 = vmul.f32 0.041666668, %v1025_v42 }
 0x88e   :  { %v1029_v44 = vadd.f32 1e-05, %v1027_v43 }
 0x890   :  { %4055 = vrsqrt.f32 %v1029_v44 }
 0x899   :  { %v4054_v45 = vpop.eup %4053 }
 0x89a   :  { %v1032_v47 = vmul.f32 %v4054_v45, %v1016_v30 }
 0x89c   :  { %v1034_v49 = vmul.f32 %v1032_v47, %v1006_v46 }
 0x89d   :  { %v4056_v50 = vpop.eup %4055 }
 0x89e   :  { %v1036_v51 = vadd.f32 %v1034_v49, %v1007_v48  ;;  %v1033_v52 = vmul.f32 %v4056_v50, %v1017_v29 }
 0x8a0   :  { %vm1038_vm8 = vcmp.ge.f32.partialorder %v1036_v51, 0.0  ;;  %v1040_v53 = vmul.f32 0.01, %v1036_v51  ;;  %v1035_v54 = vmul.f32 %v1033_v52, %v1006_v46 }
 0x8a2   :  { %v4397_v55 = vsel %vm1038_vm8, %v1036_v51, %v1040_v53  ;;  %v1037_v56 = vadd.f32 %v1035_v54, %v1007_v48 }
 0x8a3   :  { %3751 = vmatmul.mubr.msk.f32.vlgmr.msra.gmra.mxu0 %vm132_vm0, %v4397_v55 }
 0x8a4   :  { %3753 = vmatprep.mubr.msk.f32.mxu0 %vm4113_vm1, %v4112_v2  ;;  %vm1039_vm9 = vcmp.ge.f32.partialorder %v1037_v56, 0.0  ;;  %v1041_v57 = vmul.f32 0.01, %v1037_v56  ;;  %3777 = vmatpush3.msk.msra.mxu0 %vm767_vm6, %v4341_v36 }
 0x8a5   :  { %3799 = vmatprep.subr.mxu0 %v4112_v2 }
 0x8a6   :  { %v4406_v59 = vsel %vm1039_vm9, %v1037_v56, %v1041_v57 }
 0x8a7   :  { %3754 = vmatmul.mubr.msk.f32.gmra.mxu0 %vm132_vm0, %v4406_v59 }
 0x8a8   :  { %3756 = vmatprep.mubr.msk.f32.mxu0 %vm4113_vm1, %v4112_v2 }
 0x8ab   :  { %3757 = vmatmul.mubr.msk.f32.gmra.mxu0 %vm132_vm0, %v4230_v58 }
 0x8ac   :  { %3778 = vmatprep.mubr.msk.f32.mxu0 %vm4113_vm1, %v4112_v2 }
 0x963   :  { %v1120_v63 = vpop.f32.mrf.mxu0 }
 0x964   :  { %v1121_v0 = vadd.f32 %v1120_v63, %v1047_v62 }
 0x965   :  { %v3752_v1 = vpop.f32.mrf.mxu0 }
 0x966   :  { %1144 = vrot.lane.b32.xlu1 %v1121_v0, %s4114_s23 }
 0x967   :  { %v1125_v4 = vpop.f32.mrf.mxu0 }
 0x968   :  { %v1126_v7 = vadd.f32 %v1125_v4, %v1047_v62 }
 0x969   :  { %v3755_v8 = vpop.f32.mrf.mxu0 }
 0x96a   :  { %1146 = vrot.lane.b32.xlu0 %v1126_v7, %s4114_s23 }
 0x96b   :  { %v1130_v58 = vpop.f32.mrf.mxu0 }
 0x96c   :  { %v4421_v9 = vadd.f32 %v1130_v58, %v1047_v62 }
 0x96d   :  { %v3758_v11 = vpop.f32.mrf.mxu0 }
 0x96e   :  { %1383 = vrot.lane.b32.xlu0 %v1126_v7, %s4116_s13  ;;  %1153 = vrot.lane.b32.xlu1 %v4421_v9, %s4114_s23  ;;  %v1137_v17 = vrot.slane %v4421_v9, %v4429_v16  ;;  %v1141_v24 = vrot.slane %v4421_v9, %v4433_v18 }
 0x972   :  { %1248 = vperm.xlu1 %4027, %v51_v12   ;;  %v49_v12 = vsub.f32 1.0, %v4151_v3 }
 0x976   :  { %1253 = vperm.xlu1 %4027, %v52_v13  }
 0x97a   :  { %1381 = vrot.lane.b32.xlu1 %v1121_v0, %s4116_s13 }
 0x9d8   :  { %v1145_v22 = vpop.permute.xlu1 %1144 }
 0x9d9   :  { %v1150_v23 = vmul.f32 %v1145_v22, %v1137_v17 }
 0x9db   :  { %3768 = vmatmul.mubr.msk.f32.vlgmr.msra.gmra.mxu1 %vm221_vm3, %v1150_v23 }
 0x9dc   :  { %v1147_v25 = vpop.permute.xlu0 %1146  ;;  %3770 = vmatprep.mubr.msk.f32.mxu1 %vm4113_vm1, %v4112_v2 }
 0x9dd   :  { %v1151_v26 = vmul.f32 %v1147_v25, %v1141_v24 }
 0x9df   :  { %3771 = vmatmul.mubr.msk.f32.gmra.mxu1 %vm221_vm3, %v1151_v26 }
 0x9e0   :  { %v1154_v27 = vpop.permute.xlu1 %1153  ;;  %3773 = vmatprep.mubr.msk.f32.mxu1 %vm4113_vm1, %v4112_v2  ;;  %v1384_v14 = vpop.permute.xlu0 %1383 }
 0x9e1   :  { %v1156_v28 = vmul.f32 %v1154_v27, %v4421_v9 }
 0x9e3   :  { %3774 = vmatmul.mubr.msk.f32.gmra.mxu1 %vm221_vm3, %v1156_v28 }
 0x9e4   :  { %3791 = vmatprep.mubr.msk.f32.mxu1 %vm4113_vm1, %v4112_v2 }
 0x9ed   :  { %v4447_v29 = vpop.permute.xlu1 %1248 }
 0x9f1   :  { %v4451_v34 = vpop.permute.xlu1 %1253 }
 0x9f5   :  { %v1382_v17 = vpop.permute.xlu1 %1381 }
 0xa9b   :  { %v1232_v30 = vpop.f32.mrf.mxu1 }
 0xa9c   :  { %v1256_v31 = vadd.f32 %v4447_v29, %v1232_v30 }
 0xa9d   :  { %v3769_v32 = vpop.f32.mrf.mxu1 }
 0xa9e   :  { %v1258_v33 = vsel %vm742_vm7, %v1256_v31, -inf  ;;  %v1648_v32 = vld [vmem:[%s4910_s1 + $0x150] sm:$0xff] }
 0xa9f   :  { %v1259_v35 = vrot.slane %v1258_v33, 4  ;;  %v1237_v37 = vpop.f32.mrf.mxu1 }
 0xaa0   :  { %v1257_v38 = vadd.f32 %v4451_v34, %v1237_v37 }
 0xaa1   :  { %v1260_v39 = vmax.f32 %v1258_v33, %v1259_v35  ;;  %v3772_v40 = vpop.f32.mrf.mxu1 }
 0xaa2   :  { %v1265_v41 = vsel %vm742_vm7, %v1257_v38, -inf }
 0xaa3   :  { %v1261_v42 = vrot.slane %v1260_v39, 2  ;;  %v1266_v43 = vrot.slane %v1265_v41, 4  ;;  %v1242_v44 = vpop.f32.mrf.mxu1 }
 0xaa5   :  { %v1262_v45 = vmax.f32 %v1260_v39, %v1261_v42  ;;  %v1267_v46 = vmax.f32 %v1265_v41, %v1266_v43  ;;  %v3775_v47 = vpop.f32.mrf.mxu1  ;;  %v1647_v42 = vld [vmem:[%s4910_s1 + $0x118] sm:$0xff]  ;;  %v1556_v43 = vld [vmem:[%s4910_s1 + $0xd0] sm:$0xff] }
 0xaa7   :  { %v1268_v48 = vrot.slane %v1267_v46, 2  ;;  %v1263_v49 = vrot.slane %v1262_v45, 1 }
 0xaa9   :  { %v1269_v50 = vmax.f32 %v1267_v46, %v1268_v48  ;;  %v1264_v52 = vmax.f32 %v1262_v45, %v1263_v49  ;;  %v1553_v45 = vld [vmem:[%s4910_s1 + $0x28] sm:$0xff]  ;;  %v1736_v46 = vld [vmem:[%s4910_s1 + $0x190] sm:$0xff] }
 0xaab   :  { %v1270_v51 = vrot.slane %v1269_v50, 1 }
 0xaad   :  { %v1271_v53 = vmax.f32 %v1269_v50, %v1270_v51 }
 0xaaf   :  { %v1273_v54 = vsel %vm1272_vm10, %v1264_v52, %v1271_v53 }
 0xab0   :  { %v1274_v56 = vmax.f32 %v1273_v54, %v1242_v44 }
 0xab2   :  { %v1278_v57 = vrot.slane %v1274_v56, %v4429_v16  ;;  %v1282_v60 = vrot.slane %v1274_v56, %v4433_v18  ;;  %v1289_v0 = vsub.f32 %v1242_v44, %v1274_v56  ;;  %v1555_v44 = vld [vmem:[%s4910_s1 + $0x98] sm:$0xff]  ;;  %v1649_v56 = vld [vmem:[%s4910_s1 + $0x110] ss:$0 sm:$0xff] }
 0xab4   :  { %v1283_v62 = vsub.f32 %v1256_v31, %v1278_v57  ;;  %v1284_v63 = vsub.f32 %v1257_v38, %v1282_v60  ;;  %v1290_v7 = vmul.f32 1.442695, %v1289_v0  ;;  %v1735_v57 = vld [vmem:[%s4910_s1 + $0x158] sm:$0xff] }
 0xab6   :  { %v1285_v1 = vmul.f32 1.442695, %v1283_v62  ;;  %v1287_v4 = vmul.f32 1.442695, %v1284_v63  ;;  %v1734_v63 = vld [vmem:[%s4910_s1 + $0x120] sm:$0xff] }
 0xab8   :  { %4057 = vpow2.f32 %v1285_v1 }
 0xab9   :  { %4059 = vpow2.f32 %v1287_v4  ;;  %v1733_v4 = vld [vmem:[%s4910_s1 + $0xe8] sm:$0xff] }
 0xaba   :  { %4061 = vpow2.f32 %v1290_v7 }
 0xac5   :  { %v4058_v8 = vpop.eup %4057 }
 0xac6   :  { %v4060_v58 = vpop.eup %4059  ;;  %1389 = vrot.lane.b32.xlu1 %v4058_v8, %s4117_s14  ;;  %3779 = vmatmul.mubr.msk.f32.vlgmr.msra.gmra.mxu0 %vm742_vm7, %v4058_v8 }
 0xac7   :  { %1391 = vrot.lane.b32.xlu0 %v4060_v58, %s4117_s14  ;;  %3781 = vmatprep.mubr.msk.f32.mxu0 %vm4113_vm1, %v4112_v2  ;;  %v4062_v11 = vpop.eup %4061 }
 0xac8   :  { %3800 = vmatpush3.msra.mxu0 %v1556_v43 }
 0xac9   :  { %3801 = vmatprep.subr.mxu0 %v4112_v2 }
 0xaca   :  { %3782 = vmatmul.mubr.msk.f32.gmra.mxu0 %vm742_vm7, %v4060_v58 }
 0xacb   :  { %1467 = vrot.lane.b32.xlu0 %v4062_v11, %s4117_s14  ;;  %3784 = vmatprep.mubr.msk.f32.mxu0 %vm4113_vm1, %v4112_v2 }
 0xacc   :  { %3802 = vmatpush3.msra.mxu0 %v1555_v44  ;;  %v1821_v44 = vld [vmem:[%s4910_s1 + $0x112] ss:$0 sm:$0xff] }
 0xacd   :  { %3803 = vmatprep.subr.mxu0 %v4112_v2 }
 0xace   :  { %3785 = vmatmul.mubr.msk.f32.gmra.mxu0 %vm742_vm7, %v4062_v11  ;;  %v1737_v11 = vld [vmem:[%s4910_s1 + $0x111] ss:$0 sm:$0xff] }
 0xacf   :  { %1636 = vperm.xlu0 %4028, %v49_v12   ;;  %3807 = vmatprep.mubr.msk.f32.mxu0 %vm4113_vm1, %v4112_v2 }
 0xb38   :  { %v1390_v28 = vpop.permute.xlu1 %1389 }
 0xb39   :  { %v1392_v25 = vpop.permute.xlu0 %1391 }
 0xb3d   :  { %v1468_v33 = vpop.permute.xlu0 %1467 }
 0xb4a   :  { %v4488_v39 = vpop.permute.xlu0 %1636 }
 0xb4b   :  { %v4492_v40 = vmul.f32 %v4488_v39, %v4397_v55 }
 0xb86   :  { %v1367_v13 = vpop.f32.mrf.mxu0 }
 0xb87   :  { %v1387_v23 = vmul.f32 %v1382_v17, %v1367_v13 }
 0xb88   :  { %v3780_v15 = vpop.f32.mrf.mxu0 }
 0xb89   :  { %v1395_v3 = vsel %vm221_vm3, %v1387_v23, %v1390_v28 }
 0xb8a   :  { %v1372_v22 = vpop.f32.mrf.mxu0 }
 0xb8b   :  { %v1388_v24 = vmul.f32 %v1384_v14, %v1372_v22 }
 0xb8c   :  { %v3783_v26 = vpop.f32.mrf.mxu0 }
 0xb8d   :  { %v1396_v27 = vsel %vm221_vm3, %v1388_v24, %v1392_v25 }
 0xb8e   :  { %v1377_v30 = vpop.f32.mrf.mxu0  ;;  %3788 = vmatpush3.msra.mxu1 %v1396_v27 }
 0xb8f   :  { %3789 = vmatprep.subr.mxu1 %v4112_v2 }
 0xb90   :  { %v3786_v31 = vpop.f32.mrf.mxu0  ;;  %3790 = vmatpush3.msra.mxu1 %v1395_v3 }
 0xb91   :  { %3792 = vmatmul.mubr.msk.f32.vlgmr.msra.gmra.mxu1 %vm53_vm2, %v4167_v6  ;;  %3794 = vmatprep.subr.mxu1 %v4112_v2  ;;  %v50_v6 = vsub.f32 1.0, %v4161_v5  ;;  %v1646_v5 = vld [vmem:[%s4910_s1 + $0xe0] sm:$0xff] }
 0xb92   :  { %3795 = vmatpush3.msk.msra.mxu1 %vm767_vm6, %v4341_v36  ;;  %3796 = vmatprep.mubr.msk.f32.mxu1 %vm4113_vm1, %v4112_v2 }
 0xb93   :  { %3810 = vmatprep.subr.mxu1 %v1648_v32 }
 0xc51   :  { %v1463_v35 = vpop.f32.mrf.mxu1 }
 0xc52   :  { %v1470_v37 = vadd.f32 %v1468_v33, %v1463_v35 }
 0xc53   :  { %v3793_v38 = vpop.f32.mrf.mxu1 }
 0xc54   :  { %1472 = vrot.lane.b32.xlu1 %v1470_v37, %s4114_s23  ;;  %v1854_v37 = vld [vmem:[%s4910_s1 + $0x128] sm:$0xff]  ;;  %v1853_v38 = vld [vmem:[%s4910_s1 + $0xf0] sm:$0xff] }
 0xc58   :  { %1641 = vperm.xlu1 %4027, %v50_v6  }
 0xc5c   :  { %1547 = vrot.lane.b32.xlu1 %v4421_v9, %s4116_s13 }
 0xcc6   :  { %v1473_v41 = vpop.permute.xlu1 %1472 }
 0xcc7   :  { %3797 = vmatmul.mubr.msk.f32.vlgmr.msra.gmra.mxu1 %vm742_vm7, %v1473_v41 }
 0xcc8   :  { %3816 = vmatprep.mubr.msk.f32.mxu1 %vm132_vm0, %v4492_v40  ;;  %3811 = vmatpush3.msra.mxu1 %v1648_v32 }
 0xcc9   :  { %3812 = vmatprep.subr.mxu1 %v1647_v42 }
 0xcca   :  { %3813 = vmatpush3.msra.mxu1 %v1647_v42 }
 0xccb   :  { %3814 = vmatprep.subr.mxu1 %v1646_v5 }
 0xccc   :  { %3815 = vmatpush3.msra.mxu1 %v1646_v5 }
 0xccd   :  { %3830 = vmatprep.subr.mxu1 %v4112_v2 }
 0xcd3   :  { %v4504_v55 = vpop.permute.xlu1 %1641 }
 0xcd4   :  { %v1645_v9 = vmul.f32 %v4504_v55, %v4406_v59  ;;  %v1554_v59 = vld [vmem:[%s4910_s1 + $0x60] sm:$0xff] }
 0xcd5   :  { %3804 = vmatpush3.msra.mxu0 %v1554_v59 }
 0xcd6   :  { %3817 = vmatmul.mubr.msk.f32.vlgmr.msra.gmra.mxu1 %vm132_vm0, %v1645_v9  ;;  %3805 = vmatprep.subr.mxu0 %v4112_v2 }
 0xcd7   :  { %3836 = vmatprep.mubr.msk.f32.mxu1 %vm4113_vm1, %v4112_v2  ;;  %3806 = vmatpush3.msra.mxu0 %v1553_v45  ;;  %v1548_v49 = vpop.permute.xlu1 %1547  ;;  %v1822_v45 = vld [vmem:[%s4910_s1 + $0x113] ss:$0 sm:$0xff] }
 0xcd8   :  { %3819 = vmatprep.subr.mxu0 %v1736_v46  ;;  %v1550_v50 = vmul.f32 %v1548_v49, %v1377_v30 }
 0xcda   :  { %v1551_v51 = vadd.f32 %v1550_v50, %v1463_v35  ;;  %v1855_v35 = vld [vmem:[%s4910_s1 + $0x160] sm:$0xff] }
 0xcdb   :  { %3831 = vmatpush3.msra.mxu1 %v1855_v35 }
 0xcdc   :  { %3832 = vmatprep.subr.mxu1 %v4112_v2 }
 0xcdd   :  { %3833 = vmatpush3.msra.mxu1 %v1854_v37 }
 0xcde   :  { %3834 = vmatprep.subr.mxu1 %v4112_v2 }
 0xcdf   :  { %3835 = vmatpush3.msra.mxu1 %v1853_v38 }
 0xce0   :  { %3860 = vmatprep.subr.mxu1 %v4256_v10 }
 0xd87   :  { %v1542_v47 = vpop.f32.mrf.mxu1 }
 0xd88   :  { %4063 = vrcp.f32 %v1542_v47 }
 0xd89   :  { %v3798_v48 = vpop.f32.mrf.mxu1 }
 0xd95   :  { %v4064_v52 = vpop.eup %4063 }
 0xd96   :  { %v1552_v53 = vmul.f32 %v4064_v52, %v1551_v51  ;;  %v3818_v54 = vpop.f32.mrf.mxu1 }
 0xd97   :  { %v1728_v0 = vadd.f32 %v3818_v54, %v1649_v56 }
 0xd98   :  { %3808 = vmatmul.mubr.msk.f32.vlgmr.msra.gmra.mxu0 %vm221_vm3, %v1552_v53  ;;  %v1722_v60 = vpop.f32.mrf.mxu1 }
 0xd99   :  { %v1723_v62 = vadd.f32 %v1722_v60, %v1649_v56  ;;  %3820 = vmatpush3.msra.mxu0 %v1736_v46  ;;  %v1732_v7 = vmax.f32 %v1728_v0, 0.0  ;;  %v1557_v46 = vld [vmem:[%s4910_s1 + $0x69] ss:$0 sm:$0xff] }
 0xd9a   :  { %3821 = vmatprep.subr.mxu0 %v1735_v57 }
 0xd9b   :  { %v1731_v1 = vmax.f32 %v1723_v62, 0.0  ;;  %3822 = vmatpush3.msra.mxu0 %v1735_v57  ;;  %v1856_v57 = vld [vmem:[%s4910_s1 + $0x116] ss:$0 sm:$0xff] }
 0xd9c   :  { %3823 = vmatprep.subr.mxu0 %v1734_v63 }
 0xd9d   :  { %3824 = vmatpush3.msra.mxu0 %v1734_v63  ;;  %3827 = vmatprep.mubr.msk.f32.mxu0 %vm221_vm3, %v1731_v1 }
 0xd9e   :  { %3825 = vmatprep.subr.mxu0 %v1733_v4 }
 0xd9f   :  { %3826 = vmatpush3.msra.mxu0 %v1733_v4 }
 0xda0   :  { %3828 = vmatmul.mubr.msk.f32.vlgmr.msra.gmra.mxu0 %vm221_vm3, %v1732_v7 }
 0xda1   :  { %3851 = vmatprep.mubr.msk.f32.mxu0 %vm442_vm4, %v4237_v61 }
 0xe58   :  { %v1627_v8 = vpop.f32.mrf.mxu0 }
 0xe59   :  { %v1628_v51 = vadd.f32 %v1627_v8, %v1557_v46 }
 0xe5a   :  { %v3809_v58 = vpop.f32.mrf.mxu0 }
 0xe5b   :  { %v1632_v54 = vmul.f32 0.01, %v1628_v51  ;;  %vm1631_vm11 = vcmp.ge.f32.partialorder %v1628_v51, 0.0  ;;  %v4101_v58 = vld [vmem:[%s4912_s2 + $0x38] sm:$0xff] }
 0xe5d   :  { %v4587_v56 = vsel %vm1631_vm11, %v1628_v51, %v1632_v54 }
 0xe60   :  { %v3829_v12 = vpop.f32.mrf.mxu0 }
 0xe61   :  { %v1816_v13 = vadd.f32 %v3829_v12, %v1737_v11  ;;  %v4103_v12 = vld [vmem:[%s4912_s2 + $0x48] sm:$0xff] }
 0xe62   :  { %v1810_v14 = vpop.f32.mrf.mxu0 }
 0xe63   :  { %v1811_v15 = vadd.f32 %v1810_v14, %v1737_v11  ;;  %v1820_v17 = vadd.f32 %v1816_v13, %v1645_v9  ;;  %v4102_v11 = vld [vmem:[%s4912_s2 + $0x40] sm:$0xff]  ;;  %v4104_v13 = vld [vmem:[%s4912_s2 + $0x50] sm:$0xff]  ;;  %v4105_v14 = vld [vmem:[%s4912_s2 + $0x58] sm:$0xff] }
 0xe65   :  { %v1826_v22 = vsel %vm132_vm0, %v1820_v17, 0.0  ;;  %v1819_v23 = vadd.f32 %v1811_v15, %v4492_v40 }
 0xe66   :  { %1827 = vadd.xlane.f32.xlu1 %v1826_v22 }
 0xe67   :  { %v1823_v24 = vsel %vm132_vm0, %v1819_v23, 0.0 }
 0xe68   :  { %1824 = vadd.xlane.f32.xlu0 %v1823_v24 }
 0xeef   :  { %v1828_v61 = vpop.xlane.xlu1 %1827 }
 0xef0   :  { %v1830_v25 = vmul.f32 0.041666668, %v1828_v61 }
 0xef1   :  { %v1825_v26 = vpop.xlane.xlu0 %1824 }
 0xef2   :  { %v1829_v27 = vmul.f32 0.041666668, %v1825_v26  ;;  %v1832_v28 = vsub.f32 %v1820_v17, %v1830_v25 }
 0xef4   :  { %v1831_v30 = vsub.f32 %v1819_v23, %v1829_v27  ;;  %v1834_v32 = vmul.f32 %v1832_v28, %v1832_v28 }
 0xef6   :  { %v1833_v3 = vmul.f32 %v1831_v30, %v1831_v30  ;;  %v1838_v33 = vsel %vm132_vm0, %v1834_v32, 0.0 }
 0xef8   :  { %v1835_v31 = vsel %vm132_vm0, %v1833_v3, 0.0 }
 0xef9   :  { %1836 = vadd.xlane.f32.xlu0 %v1835_v31 }
 0xefd   :  { %1839 = vadd.xlane.f32.xlu0 %v1838_v33 }
 0xf82   :  { %v1837_v6 = vpop.xlane.xlu0 %1836 }
 0xf83   :  { %v1841_v40 = vmul.f32 0.041666668, %v1837_v6 }
 0xf85   :  { %v1843_v41 = vadd.f32 1e-05, %v1841_v40 }
 0xf86   :  { %v1840_v42 = vpop.xlane.xlu0 %1839 }
 0xf87   :  { %4065 = vrsqrt.f32 %v1843_v41  ;;  %v1842_v5 = vmul.f32 0.041666668, %v1840_v42 }
 0xf89   :  { %v1844_v9 = vadd.f32 1e-05, %v1842_v5 }
 0xf8b   :  { %4067 = vrsqrt.f32 %v1844_v9 }
 0xf94   :  { %v4066_v43 = vpop.eup %4065 }
 0xf95   :  { %v1847_v59 = vmul.f32 %v4066_v43, %v1831_v30 }
 0xf97   :  { %v1849_v47 = vmul.f32 %v1847_v59, %v1821_v44 }
 0xf98   :  { %v4068_v48 = vpop.eup %4067 }
 0xf99   :  { %v1851_v49 = vadd.f32 %v1849_v47, %v1822_v45  ;;  %v1848_v50 = vmul.f32 %v4068_v48, %v1832_v28 }
 0xf9b   :  { %3837 = vmatmul.mubr.msk.f32.vlgmr.msra.gmra.mxu1 %vm132_vm0, %v1851_v49  ;;  %v1850_v52 = vmul.f32 %v1848_v50, %v1821_v44 }
 0xf9c   :  { %3839 = vmatprep.mubr.msk.f32.mxu1 %vm4113_vm1, %v4112_v2  ;;  %3861 = vmatpush3.msra.mxu1 %v4256_v10 }
 0xf9d   :  { %v1852_v53 = vadd.f32 %v1850_v52, %v1822_v45  ;;  %3862 = vmatprep.subr.mxu1 %v4287_v19 }
 0xf9e   :  { %3863 = vmatpush3.msra.mxu1 %v4287_v19 }
 0xf9f   :  { %3840 = vmatmul.mubr.msk.f32.gmra.mxu1 %vm132_vm0, %v1852_v53  ;;  %3864 = vmatprep.subr.mxu1 %v4294_v20 }
 0xfa0   :  { %3842 = vmatprep.mubr.msk.f32.mxu1 %vm4113_vm1, %v4112_v2  ;;  %3865 = vmatpush3.msra.mxu1 %v4294_v20 }
 0xfa1   :  { %3866 = vmatprep.subr.mxu1 %v4301_v21 }
 0xfa2   :  { %3867 = vmatpush3.msra.mxu1 %v4301_v21 }
 0xfa3   :  { %3843 = vmatmul.mubr.msk.f32.gmra.mxu1 %vm132_vm0, %v4587_v56 }
0x105b   :  { %v1932_v10 = vpop.f32.mrf.mxu1 }
0x105c   :  { %v1933_v0 = vadd.f32 %v1932_v10, %v1856_v57 }
0x105d   :  { %v3838_v19 = vpop.f32.mrf.mxu1 }
0x105f   :  { %v1937_v60 = vpop.f32.mrf.mxu1 }
0x1060   :  { %v1938_v62 = vadd.f32 %v1937_v60, %v1856_v57 }
0x1061   :  { %v3841_v63 = vpop.f32.mrf.mxu1 }
0x1062   :  { %1951 = vrot.lane.b32.xlu1 %v1938_v62, %s4114_s23 }
0x1063   :  { %v1942_v20 = vpop.f32.mrf.mxu1 }
0x1064   :  { %v1943_v1 = vadd.f32 %v1942_v20, %v1856_v57 }
0x1065   :  { %v3844_v4 = vpop.f32.mrf.mxu1 }
0x1066   :  { %1949 = vrot.lane.b32.xlu1 %v1933_v0, %s4114_s23  ;;  %1953 = vrot.lane.b32.xlu0 %v1943_v1, %s4114_s23 }
0x10d4   :  { %v1952_v21 = vpop.permute.xlu1 %1951 }
0x10d5   :  { %v2057_v25 = vmul.f32 %v1952_v21, %v1938_v62 }
0x10d8   :  { %v1950_v7 = vpop.permute.xlu1 %1949  ;;  %v1954_v8 = vpop.permute.xlu0 %1953 }
0x10d9   :  { %2376 = vrot.lane.b32.xlu0 %v1950_v7, %s4114_s23  ;;  %3845 = vmatprep.subr.msk.mxu0 %vm461_vm5, %v1954_v8  ;;  %v2056_v24 = vmul.f32 %v1950_v7, %v1933_v0 }
0x10da   :  { %3846 = vmatpush3.msk.msra.mxu0 %vm461_vm5, %v1954_v8 }
0x10db   :  { %3847 = vmatprep.subr.mxu0 %v1952_v21 }
0x10dc   :  { %3848 = vmatpush3.msra.mxu0 %v1952_v21 }
0x10dd   :  { %2378 = vrot.lane.b32.xlu0 %v1952_v21, %s4114_s23  ;;  %3849 = vmatprep.subr.mxu0 %v1950_v7 }
0x10de   :  { %3850 = vmatpush3.msra.mxu0 %v1950_v7 }
0x10df   :  { %3852 = vmatmul.mubr.msk.f32.vlgmr.msra.gmra.mxu0 %vm442_vm4, %v4101_v58  ;;  %3880 = vmatprep.subr.msk.mxu0 %vm767_vm6, %v4341_v36 }
0x10e0   :  { %3854 = vmatprep.mubr.msk.f32.mxu0 %vm442_vm4, %v4102_v11  ;;  %3881 = vmatpush3.msk.msra.mxu0 %vm767_vm6, %v4341_v36 }
0x10e1   :  { %3920 = vmatprep.subr.mxu0 %v4112_v2 }
0x10e3   :  { %3855 = vmatmul.mubr.msk.f32.gmra.mxu0 %vm442_vm4, %v4103_v12 }
0x10e4   :  { %3857 = vmatprep.mubr.msk.f32.mxu0 %vm442_vm4, %v4104_v13 }
0x10e7   :  { %3858 = vmatmul.mubr.msk.f32.gmra.mxu0 %vm442_vm4, %v4105_v14 }
0x119f   :  { %v3853_v36 = vpop.f32.mrf.mxu0 }
0x11a0   :  { %2374 = vrot.lane.b32.xlu1 %v3853_v36, %s4114_s23  ;;  %v2055_v22 = vmul.f32 %v3853_v36, %v1938_v62 }
0x11a1   :  { %v2025_v15 = vpop.f32.mrf.mxu0 }
0x11a2   :  { %v2054_v17 = vmul.f32 %v2025_v15, %v1933_v0 }
0x11a3   :  { %v3856_v23 = vpop.f32.mrf.mxu0 }
0x11a4   :  { %2372 = vrot.lane.b32.xlu1 %v2025_v15, %s4114_s23  ;;  %3868 = vmatprep.mubr.msk.f32.mxu1 %vm221_vm3, %v2054_v17  ;;  %v2059_v30 = vmul.f32 %v3856_v23, %v1938_v62 }
0x11a5   :  { %v2035_v61 = vpop.f32.mrf.mxu0  ;;  %3869 = vmatmul.mubr.msk.f32.vlgmr.msra.gmra.mxu1 %vm221_vm3, %v2055_v22  ;;  %2382 = vrot.lane.b32.xlu0 %v3856_v23, %s4114_s23 }
0x11a6   :  { %3871 = vmatprep.mubr.msk.f32.mxu1 %vm221_vm3, %v2056_v24  ;;  %v2058_v27 = vmul.f32 %v2035_v61, %v1933_v0 }
0x11a7   :  { %v3859_v26 = vpop.f32.mrf.mxu0 }
0x11a8   :  { %2380 = vrot.lane.b32.xlu1 %v2035_v61, %s4114_s23  ;;  %v2061_v31 = vmul.f32 %v3859_v26, %v1938_v62 }
0x11a9   :  { %v2045_v28 = vpop.f32.mrf.mxu0  ;;  %3872 = vmatmul.mubr.msk.f32.gmra.mxu1 %vm221_vm3, %v2057_v25  ;;  %2386 = vrot.lane.b32.xlu0 %v3859_v26, %s4114_s23  ;;  %v4106_v25 = vld [vmem:[%s4912_s2 + $0x20] sm:$0xff] }
0x11aa   :  { %3874 = vmatprep.mubr.msk.f32.mxu1 %vm221_vm3, %v2058_v27  ;;  %v2060_v3 = vmul.f32 %v2045_v28, %v1933_v0 }
0x11ac   :  { %2384 = vrot.lane.b32.xlu1 %v2045_v28, %s4114_s23  ;;  %v4107_v28 = vld [vmem:[%s4912_s2 + $0x18] sm:$0xff] }
0x11ad   :  { %3875 = vmatmul.mubr.msk.f32.gmra.mxu1 %vm221_vm3, %v2059_v30  ;;  %v4108_v30 = vld [vmem:[%s4912_s2 + $0x10] sm:$0xff] }
0x11ae   :  { %3877 = vmatprep.mubr.msk.f32.mxu1 %vm221_vm3, %v2060_v3 }
0x11b1   :  { %3878 = vmatmul.mubr.msk.f32.gmra.mxu1 %vm221_vm3, %v2061_v31 }
0x1265   :  { %v3870_v32 = vpop.f32.mrf.mxu1 }
0x1267   :  { %v2152_v33 = vpop.f32.mrf.mxu1 }
0x1269   :  { %v3873_v35 = vpop.f32.mrf.mxu1 }
0x126a   :  { %v2192_v41 = vmax.f32 %v3870_v32, %v3873_v35 }
0x126b   :  { %v2162_v37 = vpop.f32.mrf.mxu1 }
0x126c   :  { %v2191_v44 = vmax.f32 %v2152_v33, %v2162_v37 }
0x126d   :  { %v3876_v38 = vpop.f32.mrf.mxu1 }
0x126f   :  { %v2172_v6 = vpop.f32.mrf.mxu1 }
0x1271   :  { %v3879_v40 = vpop.f32.mrf.mxu1 }
0x1272   :  { %v2194_v42 = vmax.f32 %v3876_v38, %v3879_v40 }
0x1273   :  { %v2182_v5 = vpop.f32.mrf.mxu1 }
0x1274   :  { %v2196_v9 = vmax.f32 %v2192_v41, %v2194_v42  ;;  %v2193_v43 = vmax.f32 %v2172_v6, %v2182_v5  ;;  %v2377_v41 = vpop.permute.xlu0 %2376 }
0x1276   :  { %v2198_v59 = vsub.f32 %v3870_v32, %v2196_v9  ;;  %v2200_v45 = vsub.f32 %v3873_v35, %v2196_v9  ;;  %v2202_v46 = vsub.f32 %v3876_v38, %v2196_v9  ;;  %v2195_v47 = vmax.f32 %v2191_v44, %v2193_v43  ;;  %v4109_v32 = vld [vmem:[%s4912_s2 + $0x8] sm:$0xff]  ;;  %v2413_v35 = vld [vmem:[%s4910_s1 + $0x1a0] sm:$0xff]  ;;  %v2411_v38 = vld [vmem:[%s4910_s1 + $0x130] sm:$0xff] }
0x1277   :  { %v2204_v48 = vsub.f32 %v3879_v40, %v2196_v9  ;;  %3894 = vmatprep.subr.mxu1 %v2413_v35  ;;  %v2375_v40 = vpop.permute.xlu1 %2374 }
0x1278   :  { %v2207_v49 = vmul.f32 1.442695, %v2198_v59  ;;  %v2211_v50 = vmul.f32 1.442695, %v2200_v45  ;;  %v2215_v51 = vmul.f32 1.442695, %v2202_v46  ;;  %v2197_v52 = vsub.f32 %v2152_v33, %v2195_v47  ;;  %3895 = vmatpush3.msra.mxu1 %v2413_v35  ;;  %v2379_v43 = vpop.permute.xlu0 %2378 }
0x1279   :  { %v2199_v53 = vsub.f32 %v2162_v37, %v2195_v47  ;;  %v2201_v54 = vsub.f32 %v2172_v6, %v2195_v47  ;;  %v2203_v10 = vsub.f32 %v2182_v5, %v2195_v47  ;;  %v2219_v60 = vmul.f32 1.442695, %v2204_v48  ;;  %v2412_v37 = vld [vmem:[%s4910_s1 + $0x168] sm:$0xff]  ;;  %v2410_v6 = vld [vmem:[%s4910_s1 + $0xf8] sm:$0xff] }
0x127a   :  { %4069 = vpow2.f32 %v2207_v49  ;;  %v2205_v19 = vmul.f32 1.442695, %v2197_v52  ;;  %3896 = vmatprep.subr.mxu1 %v2412_v37 }
0x127b   :  { %4071 = vpow2.f32 %v2211_v50  ;;  %v2209_v57 = vmul.f32 1.442695, %v2199_v53  ;;  %v2213_v62 = vmul.f32 1.442695, %v2201_v54  ;;  %v2217_v63 = vmul.f32 1.442695, %v2203_v10  ;;  %3897 = vmatpush3.msra.mxu1 %v2412_v37  ;;  %v2373_v5 = vpop.permute.xlu1 %2372 }
0x127c   :  { %4073 = vpow2.f32 %v2215_v51  ;;  %3898 = vmatprep.subr.mxu1 %v2411_v38  ;;  %v2383_v45 = vpop.permute.xlu0 %2382 }
0x127d   :  { %4075 = vpow2.f32 %v2205_v19  ;;  %3899 = vmatpush3.msra.mxu1 %v2411_v38 }
0x127e   :  { %4077 = vpow2.f32 %v2209_v57  ;;  %3900 = vmatprep.subr.mxu1 %v2410_v6 }
0x127f   :  { %4079 = vpow2.f32 %v2219_v60  ;;  %3901 = vmatpush3.msra.mxu1 %v2410_v6  ;;  %v2381_v46 = vpop.permute.xlu1 %2380 }
0x1280   :  { %4081 = vpow2.f32 %v2213_v62  ;;  %3905 = vmatprep.subr.mxu1 %v4112_v2  ;;  %v2387_v19 = vpop.permute.xlu0 %2386 }
0x1281   :  { %4083 = vpow2.f32 %v2217_v63 }
0x1283   :  { %v2385_v60 = vpop.permute.xlu1 %2384 }
0x1287   :  { %v4070_v20 = vpop.eup %4069 }
0x1288   :  { %v4072_v0 = vpop.eup %4071 }
0x1289   :  { %v2222_v1 = vadd.f32 %v4072_v0, %v4070_v20  ;;  %v4074_v4 = vpop.eup %4073 }
0x128a   :  { %v4076_v21 = vpop.eup %4075 }
0x128b   :  { %v2224_v7 = vadd.f32 %v4074_v4, %v2222_v1  ;;  %v4078_v8 = vpop.eup %4077 }
0x128c   :  { %v4080_v58 = vpop.eup %4079  ;;  %v2221_v11 = vadd.f32 %v4078_v8, %v4076_v21 }
0x128d   :  { %v4082_v12 = vpop.eup %4081  ;;  %v2226_v13 = vadd.f32 %v4080_v58, %v2224_v7 }
0x128e   :  { %v2223_v14 = vadd.f32 %v4082_v12, %v2221_v11  ;;  %v4084_v36 = vpop.eup %4083 }
0x128f   :  { %4085 = vrcp.f32 %v2226_v13 }
0x1290   :  { %v2225_v15 = vadd.f32 %v4084_v36, %v2223_v14 }
0x1292   :  { %4087 = vrcp.f32 %v2225_v15 }
0x129c   :  { %v4086_v17 = vpop.eup %4085 }
0x129d   :  { %v2230_v24 = vmul.f32 %v4086_v17, %v4070_v20  ;;  %v2232_v26 = vmul.f32 %v4086_v17, %v4072_v0  ;;  %v2234_v3 = vmul.f32 %v4086_v17, %v4074_v4  ;;  %v2236_v33 = vmul.f32 %v4086_v17, %v4080_v58 }
0x129f   :  { %v4088_v22 = vpop.eup %4087 }
0x12a0   :  { %v2229_v23 = vmul.f32 %v4088_v22, %v4076_v21  ;;  %v2231_v61 = vmul.f32 %v4088_v22, %v4078_v8  ;;  %v2233_v27 = vmul.f32 %v4088_v22, %v4082_v12  ;;  %v2235_v31 = vmul.f32 %v4088_v22, %v4084_v36  ;;  %v2414_v8 = vld [vmem:[%s4910_s1 + $0x117] ss:$0 sm:$0xff] }
0x12a2   :  { %3882 = vmatprep.mubr.msk.f32.mxu0 %vm742_vm7, %v2229_v23 }
0x12a3   :  { %3883 = vmatmul.mubr.msk.f32.vlgmr.msra.gmra.mxu0 %vm742_vm7, %v2230_v24 }
0x12a4   :  { %3885 = vmatprep.mubr.msk.f32.mxu0 %vm742_vm7, %v2231_v61  ;;  %3921 = vmatpush3.msra.mxu0 %v4106_v25 }
0x12a5   :  { %3922 = vmatprep.subr.mxu0 %v4112_v2 }
0x12a6   :  { %3923 = vmatpush3.msra.mxu0 %v4107_v28 }
0x12a7   :  { %3886 = vmatmul.mubr.msk.f32.gmra.mxu0 %vm742_vm7, %v2232_v26  ;;  %3924 = vmatprep.subr.mxu0 %v4112_v2 }
0x12a8   :  { %3888 = vmatprep.mubr.msk.f32.mxu0 %vm742_vm7, %v2233_v27  ;;  %3925 = vmatpush3.msra.mxu0 %v4108_v30  ;;  %v2536_v30 = vld [vmem:[%s4910_s1 + $0x170] sm:$0xff] }
0x12a9   :  { %3926 = vmatprep.subr.mxu0 %v4112_v2 }
0x12aa   :  { %3927 = vmatpush3.msra.mxu0 %v4109_v32 }
0x12ab   :  { %3889 = vmatmul.mubr.msk.f32.gmra.mxu0 %vm742_vm7, %v2234_v3  ;;  %3948 = vmatprep.subr.mxu0 %v4112_v2  ;;  %v2535_v3 = vld [vmem:[%s4910_s1 + $0x138] sm:$0xff] }
0x12ac   :  { %3891 = vmatprep.mubr.msk.f32.mxu0 %vm742_vm7, %v2235_v31  ;;  %v2534_v31 = vld [vmem:[%s4910_s1 + $0x100] sm:$0xff] }
0x12af   :  { %3892 = vmatmul.mubr.msk.f32.gmra.mxu0 %vm742_vm7, %v2236_v33 }
0x12b0   :  { %3928 = vmatprep.mubr.msk.f32.mxu0 %vm4113_vm1, %v4112_v2 }
0x1363   :  { %v3884_v42 = vpop.f32.mrf.mxu0 }
0x1364   :  { %v2397_v53 = vmul.f32 %v3884_v42, %v2375_v40 }
0x1365   :  { %v2327_v9 = vpop.f32.mrf.mxu0 }
0x1366   :  { %v2396_v51 = vmul.f32 %v2373_v5, %v2327_v9  ;;  %v2497_v5 = vld [vmem:[%s4910_s1 + $0x115] ss:$0 sm:$0xff] }
0x1367   :  { %v3887_v44 = vpop.f32.mrf.mxu0 }
0x1368   :  { %v2399_v49 = vmul.f32 %v3887_v44, %v2379_v43 }
0x1369   :  { %v2337_v59 = vpop.f32.mrf.mxu0 }
0x136a   :  { %v2398_v48 = vmul.f32 %v2377_v41, %v2337_v59  ;;  %v2405_v62 = vadd.f32 %v2399_v49, %v2397_v53  ;;  %v2496_v41 = vld [vmem:[%s4910_s1 + $0x114] ss:$0 sm:$0xff] }
0x136b   :  { %v3890_v47 = vpop.f32.mrf.mxu0 }
0x136c   :  { %v2401_v54 = vmul.f32 %v3890_v47, %v2383_v45  ;;  %v2404_v57 = vadd.f32 %v2398_v48, %v2396_v51 }
0x136d   :  { %v2347_v50 = vpop.f32.mrf.mxu0 }
0x136e   :  { %v2400_v52 = vmul.f32 %v2381_v46, %v2347_v50  ;;  %v2407_v4 = vadd.f32 %v2405_v62, %v2401_v54  ;;  %v4718_v50 = vld [vmem:[%s4912_s2 + $0x28] sm:$0xf] }
0x136f   :  { %v3893_v10 = vpop.f32.mrf.mxu0 }
0x1370   :  { %v2403_v63 = vmul.f32 %v3893_v10, %v2387_v19  ;;  %v2406_v0 = vadd.f32 %v2404_v57, %v2400_v52  ;;  %v2537_v52 = vld [vmem:[%s4910_s1 + $0x148] ss:$0 sm:$0xff] }
0x1371   :  { %v2357_v20 = vpop.f32.mrf.mxu0 }
0x1372   :  { %v2402_v1 = vmul.f32 %v2385_v60, %v2357_v20  ;;  %v2409_v7 = vadd.f32 %v2407_v4, %v2403_v63 }
0x1374   :  { %v2408_v21 = vadd.f32 %v2406_v0, %v2402_v1 }
0x1376   :  { %3902 = vmatprep.mubr.msk.f32.mxu1 %vm221_vm3, %v2408_v21 }
0x1377   :  { %3903 = vmatmul.mubr.msk.f32.vlgmr.msra.gmra.mxu1 %vm221_vm3, %v2409_v7 }
0x1378   :  { %3911 = vmatprep.mubr.msk.f32.mxu1 %vm4113_vm1, %v4112_v2  ;;  %3906 = vmatpush3.msra.mxu1 %v2536_v30 }
0x1379   :  { %3907 = vmatprep.subr.mxu1 %v4112_v2 }
0x137a   :  { %3908 = vmatpush3.msra.mxu1 %v2535_v3 }
0x137b   :  { %3909 = vmatprep.subr.mxu1 %v4112_v2 }
0x137c   :  { %3910 = vmatpush3.msra.mxu1 %v2534_v31 }
0x137d   :  { %3937 = vmatprep.subr.mxu1 %v4112_v2 }
0x1437   :  { %v3904_v58 = vpop.f32.mrf.mxu1 }
0x1438   :  { %v2493_v11 = vadd.f32 %v3904_v58, %v2414_v8 }
0x1439   :  { %v2487_v12 = vpop.f32.mrf.mxu1 }
0x143a   :  { %v2488_v13 = vadd.f32 %v2487_v12, %v2414_v8  ;;  %v2501_v14 = vsel %vm132_vm0, %v2493_v11, 0.0 }
0x143b   :  { %2502 = vadd.xlane.f32.xlu0 %v2501_v14 }
0x143c   :  { %v2498_v36 = vsel %vm132_vm0, %v2488_v13, 0.0 }
0x143d   :  { %2499 = vadd.xlane.f32.xlu1 %v2498_v36 }
0x14c4   :  { %v2503_v15 = vpop.xlane.xlu0 %2502 }
0x14c5   :  { %v2505_v17 = vmul.f32 0.041666668, %v2503_v15 }
0x14c6   :  { %v2500_v22 = vpop.xlane.xlu1 %2499 }
0x14c7   :  { %v2504_v23 = vmul.f32 0.041666668, %v2500_v22  ;;  %v2507_v24 = vsub.f32 %v2493_v11, %v2505_v17 }
0x14c9   :  { %v2506_v61 = vsub.f32 %v2488_v13, %v2504_v23  ;;  %v2509_v27 = vmul.f32 %v2507_v24, %v2507_v24 }
0x14cb   :  { %v2508_v25 = vmul.f32 %v2506_v61, %v2506_v61  ;;  %v2513_v28 = vsel %vm132_vm0, %v2509_v27, 0.0 }
0x14cd   :  { %v2510_v26 = vsel %vm132_vm0, %v2508_v25, 0.0 }
0x14ce   :  { %2511 = vadd.xlane.f32.xlu0 %v2510_v26 }
0x14d2   :  { %2514 = vadd.xlane.f32.xlu0 %v2513_v28 }
0x1557   :  { %v2512_v32 = vpop.xlane.xlu0 %2511 }
0x1558   :  { %v2516_v33 = vmul.f32 0.041666668, %v2512_v32 }
0x155a   :  { %v2518_v35 = vadd.f32 1e-05, %v2516_v33 }
0x155b   :  { %v2515_v37 = vpop.xlane.xlu0 %2514 }
0x155c   :  { %4089 = vrsqrt.f32 %v2518_v35  ;;  %v2517_v38 = vmul.f32 0.041666668, %v2515_v37 }
0x155e   :  { %v2519_v6 = vadd.f32 1e-05, %v2517_v38 }
0x1560   :  { %4091 = vrsqrt.f32 %v2519_v6 }
0x1569   :  { %v4090_v40 = vpop.eup %4089 }
0x156a   :  { %v2522_v42 = vmul.f32 %v4090_v40, %v2506_v61 }
0x156c   :  { %v2524_v9 = vmul.f32 %v2522_v42, %v2496_v41 }
0x156d   :  { %v4092_v43 = vpop.eup %4091 }
0x156e   :  { %v2526_v44 = vadd.f32 %v2524_v9, %v2497_v5  ;;  %v2523_v59 = vmul.f32 %v4092_v43, %v2507_v24 }
0x1570   :  { %vm2528_vm12 = vcmp.ge.f32.partialorder %v2526_v44, 0.0  ;;  %v2530_v45 = vmul.f32 0.01, %v2526_v44  ;;  %v2525_v46 = vmul.f32 %v2523_v59, %v2496_v41 }
0x1572   :  { %v4709_v47 = vsel %vm2528_vm12, %v2526_v44, %v2530_v45  ;;  %v2527_v48 = vadd.f32 %v2525_v46, %v2497_v5 }
0x1573   :  { %3912 = vmatmul.mubr.msk.f32.vlgmr.msra.gmra.mxu1 %vm132_vm0, %v4709_v47 }
0x1574   :  { %3914 = vmatprep.mubr.msk.f32.mxu1 %vm4113_vm1, %v4112_v2  ;;  %vm2529_vm13 = vcmp.ge.f32.partialorder %v2527_v48, 0.0  ;;  %v2531_v49 = vmul.f32 0.01, %v2527_v48  ;;  %3938 = vmatpush3.msk.msra.mxu1 %vm767_vm6, %v4718_v50 }
0x1575   :  { %3960 = vmatprep.subr.mxu1 %v4112_v2 }
0x1576   :  { %v4723_v51 = vsel %vm2529_vm13, %v2527_v48, %v2531_v49 }
0x1577   :  { %3915 = vmatmul.mubr.msk.f32.gmra.mxu1 %vm132_vm0, %v4723_v51 }
0x1578   :  { %3917 = vmatprep.mubr.msk.f32.mxu1 %vm4113_vm1, %v4112_v2 }
0x157b   :  { %3918 = vmatmul.mubr.msk.f32.gmra.mxu1 %vm132_vm0, %v4587_v56 }
0x157c   :  { %3939 = vmatprep.mubr.msk.f32.mxu1 %vm4113_vm1, %v4112_v2 }
0x1633   :  { %v2610_v53 = vpop.f32.mrf.mxu1 }
0x1634   :  { %v2611_v54 = vadd.f32 %v2610_v53, %v2537_v52 }
0x1635   :  { %v3913_v10 = vpop.f32.mrf.mxu1 }
0x1636   :  { %2634 = vrot.lane.b32.xlu1 %v2611_v54, %s4114_s23 }
0x1637   :  { %v2615_v19 = vpop.f32.mrf.mxu1 }
0x1638   :  { %v2616_v57 = vadd.f32 %v2615_v19, %v2537_v52 }
0x1639   :  { %v3916_v60 = vpop.f32.mrf.mxu1 }
0x163a   :  { %2636 = vrot.lane.b32.xlu0 %v2616_v57, %s4114_s23 }
0x163b   :  { %v2620_v62 = vpop.f32.mrf.mxu1 }
0x163c   :  { %v4738_v63 = vadd.f32 %v2620_v62, %v2537_v52 }
0x163d   :  { %v3919_v56 = vpop.f32.mrf.mxu1 }
0x163e   :  { %2643 = vrot.lane.b32.xlu1 %v4738_v63, %s4114_s23  ;;  %v2627_v20 = vrot.slane %v4738_v63, %v4429_v16  ;;  %v2631_v4 = vrot.slane %v4738_v63, %v4433_v18  ;;  %v4111_v56 = vld [vmem:[%s4912_s2] sm:$0x3] }
0x1642   :  { %2862 = vrot.lane.b32.xlu1 %v2616_v57, %s4116_s13 }
0x1646   :  { %2860 = vrot.lane.b32.xlu1 %v2611_v54, %s4116_s13 }
0x16a8   :  { %v2635_v0 = vpop.permute.xlu1 %2634 }
0x16a9   :  { %v2640_v1 = vmul.f32 %v2635_v0, %v2627_v20 }
0x16ab   :  { %3929 = vmatmul.mubr.msk.f32.vlgmr.msra.gmra.mxu0 %vm221_vm3, %v2640_v1 }
0x16ac   :  { %v2637_v21 = vpop.permute.xlu0 %2636  ;;  %3931 = vmatprep.mubr.msk.f32.mxu0 %vm4113_vm1, %v4112_v2 }
0x16ad   :  { %v2641_v7 = vmul.f32 %v2637_v21, %v2631_v4 }
0x16af   :  { %3932 = vmatmul.mubr.msk.f32.gmra.mxu0 %vm221_vm3, %v2641_v7 }
0x16b0   :  { %v2644_v8 = vpop.permute.xlu1 %2643  ;;  %3934 = vmatprep.mubr.msk.f32.mxu0 %vm4113_vm1, %v4112_v2 }
0x16b1   :  { %v2646_v58 = vmul.f32 %v2644_v8, %v4738_v63 }
0x16b3   :  { %3935 = vmatmul.mubr.msk.f32.gmra.mxu0 %vm221_vm3, %v2646_v58  ;;  %v3114_v58 = vmul.f32 %v4723_v51, %v4504_v55  ;;  %v3034_v55 = vld [vmem:[%s4910_s1 + $0x178] sm:$0xff]  ;;  %v3032_v51 = vld [vmem:[%s4910_s1 + $0x108] sm:$0xff] }
0x16b4   :  { %3952 = vmatprep.mubr.msk.f32.mxu0 %vm4113_vm1, %v4112_v2 }
0x176b   :  { %v2722_v11 = vpop.f32.mrf.mxu0 }
0x176c   :  { %v2736_v12 = vadd.f32 %v2722_v11, %v4447_v29 }
0x176d   :  { %v3930_v13 = vpop.f32.mrf.mxu0 }
0x176e   :  { %v2738_v14 = vsel %vm742_vm7, %v2736_v12, -inf  ;;  %v31_v13 = vld [vmem:[%s4912_s2 + $0x88] sm:$0xff] }
0x176f   :  { %v2739_v36 = vrot.slane %v2738_v14, 4  ;;  %v2727_v15 = vpop.f32.mrf.mxu0 }
0x1770   :  { %v2737_v17 = vadd.f32 %v2727_v15, %v4451_v34 }
0x1771   :  { %v2740_v22 = vmax.f32 %v2738_v14, %v2739_v36  ;;  %v3933_v23 = vpop.f32.mrf.mxu0  ;;  %v30_v14 = vld [vmem:[%s4912_s2 + $0x80] sm:$0xff] }
0x1772   :  { %v2745_v24 = vsel %vm742_vm7, %v2737_v17, -inf }
0x1773   :  { %v2741_v61 = vrot.slane %v2740_v22, 2  ;;  %v2746_v25 = vrot.slane %v2745_v24, 4  ;;  %v2732_v26 = vpop.f32.mrf.mxu0 }
0x1775   :  { %v2742_v27 = vmax.f32 %v2740_v22, %v2741_v61  ;;  %v2747_v28 = vmax.f32 %v2745_v24, %v2746_v25  ;;  %v3936_v30 = vpop.f32.mrf.mxu0  ;;  %v29_v61 = vld [vmem:[%s4912_s2 + $0x78] sm:$0xff]  ;;  %v28_v25 = vld [vmem:[%s4912_s2 + $0x70] sm:$0xff] }
0x1776   :  { %v42_v30 = vld [vmem:[%s4912_s2 + $0xe0] sm:$0xff] }
0x1777   :  { %v2748_v3 = vrot.slane %v2747_v28, 2  ;;  %v2743_v31 = vrot.slane %v2742_v27, 1 }
0x1779   :  { %v2749_v29 = vmax.f32 %v2747_v28, %v2748_v3  ;;  %v2744_v33 = vmax.f32 %v2742_v27, %v2743_v31  ;;  %v26_v27 = vld [vmem:[%s4912_s2 + $0x60] sm:$0xff]  ;;  %v43_v28 = vld [vmem:[%s4912_s2 + $0xe8] sm:$0xff]  ;;  %v41_v3 = vld [vmem:[%s4912_s2 + $0xd8] sm:$0xff] }
0x177a   :  { %v40_v31 = vld [vmem:[%s4912_s2 + $0xd0] sm:$0xff] }
0x177b   :  { %v2750_v32 = vrot.slane %v2749_v29, 1 }
0x177d   :  { %v2751_v35 = vmax.f32 %v2749_v29, %v2750_v32  ;;  %v39_v29 = vld [vmem:[%s4912_s2 + $0xc8] sm:$0xff]  ;;  %v38_v32 = vld [vmem:[%s4912_s2 + $0xc0] sm:$0xff] }
0x177f   :  { %v2752_v37 = vsel %vm1272_vm10, %v2744_v33, %v2751_v35  ;;  %v37_v33 = vld [vmem:[%s4912_s2 + $0xb8] sm:$0xff]  ;;  %v36_v35 = vld [vmem:[%s4912_s2 + $0xb0] sm:$0xff] }
0x1780   :  { %v2753_v38 = vmax.f32 %v2752_v37, %v2732_v26  ;;  %v35_v37 = vld [vmem:[%s4912_s2 + $0xa8] sm:$0xff] }
0x1782   :  { %v2757_v34 = vrot.slane %v2753_v38, %v4429_v16  ;;  %v2761_v6 = vrot.slane %v2753_v38, %v4433_v18  ;;  %v2768_v42 = vsub.f32 %v2732_v26, %v2753_v38  ;;  %v2863_v18 = vpop.permute.xlu1 %2862  ;;  %v27_v26 = vld [vmem:[%s4912_s2 + $0x68] sm:$0xff] }
0x1783   :  { %v3036_v38 = vld [vmem:[%s4910_s1 + $0x149] ss:$0 sm:$0xff] }
0x1784   :  { %v2762_v40 = vsub.f32 %v2736_v12, %v2757_v34  ;;  %v2763_v41 = vsub.f32 %v2737_v17, %v2761_v6  ;;  %v2769_v43 = vmul.f32 1.442695, %v2768_v42  ;;  %v48_v12 = vld [vmem:[%s4911_s0 + $0x10] sm:$0x3] }
0x1786   :  { %v2764_v5 = vmul.f32 1.442695, %v2762_v40  ;;  %v2766_v9 = vmul.f32 1.442695, %v2763_v41  ;;  %v2861_v48 = vpop.permute.xlu1 %2860 }
0x1788   :  { %4093 = vpow2.f32 %v2764_v5 }
0x1789   :  { %4095 = vpow2.f32 %v2766_v9 }
0x178a   :  { %4097 = vpow2.f32 %v2769_v43  ;;  %v34_v43 = vld [vmem:[%s4912_s2 + $0xa0] sm:$0xff] }
0x1795   :  { %v4094_v44 = vpop.eup %4093 }
0x1796   :  { %v4096_v59 = vpop.eup %4095  ;;  %2868 = vrot.lane.b32.xlu1 %v4094_v44, %s4117_s14  ;;  %3940 = vmatmul.mubr.msk.f32.vlgmr.msra.gmra.mxu1 %vm742_vm7, %v4094_v44  ;;  %v33_v44 = vld [vmem:[%s4912_s2 + $0x98] sm:$0xff] }
0x1797   :  { %2870 = vrot.lane.b32.xlu0 %v4096_v59, %s4117_s14  ;;  %3942 = vmatprep.mubr.msk.f32.mxu1 %vm4113_vm1, %v4112_v2  ;;  %v4098_v16 = vpop.eup %4097 }
0x179a   :  { %3943 = vmatmul.mubr.msk.f32.gmra.mxu1 %vm742_vm7, %v4096_v59  ;;  %v32_v59 = vld [vmem:[%s4912_s2 + $0x90] sm:$0xff] }
0x179b   :  { %2946 = vrot.lane.b32.xlu0 %v4098_v16, %s4117_s14  ;;  %3945 = vmatprep.mubr.msk.f32.mxu1 %vm4113_vm1, %v4112_v2 }
0x179e   :  { %3946 = vmatmul.mubr.msk.f32.gmra.mxu1 %vm742_vm7, %v4098_v16  ;;  %v3452_v16 = vld [vmem:[%s4912_s2 + $0xf0] ss:$0 sm:$0xff] }
0x179f   :  { %3026 = vrot.lane.b32.xlu0 %v4738_v63, %s4116_s13  ;;  %3968 = vmatprep.mubr.msk.f32.mxu1 %vm4113_vm1, %v4112_v2 }
0x1808   :  { %v2869_v57 = vpop.permute.xlu1 %2868 }
0x1809   :  { %v2871_v54 = vpop.permute.xlu0 %2870 }
0x180d   :  { %v2947_v20 = vpop.permute.xlu0 %2946 }
0x1811   :  { %v3027_v0 = vpop.permute.xlu0 %3026 }
0x1856   :  { %v2846_v45 = vpop.f32.mrf.mxu1 }
0x1857   :  { %v2866_v52 = vmul.f32 %v2861_v48, %v2846_v45 }
0x1858   :  { %v3941_v46 = vpop.f32.mrf.mxu1 }
0x1859   :  { %v2874_v62 = vsel %vm221_vm3, %v2866_v52, %v2869_v57 }
0x185a   :  { %v2851_v49 = vpop.f32.mrf.mxu1 }
0x185b   :  { %v2867_v53 = vmul.f32 %v2863_v18, %v2851_v49  ;;  %v3454_v49 = vld [vmem:[%s4912_s2 + $0xf1] ss:$0 sm:$0xff] }
0x185c   :  { %v3944_v10 = vpop.f32.mrf.mxu1 }
0x185d   :  { %v2875_v19 = vsel %vm221_vm3, %v2867_v53, %v2871_v54 }
0x185e   :  { %v2856_v60 = vpop.f32.mrf.mxu1  ;;  %3949 = vmatpush3.msra.mxu0 %v2875_v19 }
0x185f   :  { %3950 = vmatprep.subr.mxu0 %v4112_v2  ;;  %v3029_v1 = vmul.f32 %v3027_v0, %v2856_v60 }
0x1860   :  { %v3947_v63 = vpop.f32.mrf.mxu1  ;;  %3951 = vmatpush3.msra.mxu0 %v2874_v62 }
0x1861   :  { %3953 = vmatmul.mubr.msk.f32.vlgmr.msra.gmra.mxu0 %vm53_vm2, %v4111_v56  ;;  %3955 = vmatprep.subr.mxu0 %v4112_v2 }
0x1862   :  { %3956 = vmatpush3.msk.msra.mxu0 %vm767_vm6, %v4718_v50  ;;  %3957 = vmatprep.mubr.msk.f32.mxu0 %vm4113_vm1, %v4112_v2  ;;  %v3113_v50 = vmul.f32 %v4709_v47, %v4488_v39  ;;  %v3035_v39 = vld [vmem:[%s4910_s1 + $0x1b0] sm:$0xff]  ;;  %v3033_v47 = vld [vmem:[%s4910_s1 + $0x140] sm:$0xff] }
0x1863   :  { %3971 = vmatprep.subr.mxu0 %v4112_v2  ;;  %3961 = vmatpush3.msra.mxu1 %v3035_v39 }
0x1864   :  { %3962 = vmatprep.subr.mxu1 %v4112_v2 }
0x1865   :  { %3963 = vmatpush3.msra.mxu1 %v3034_v55 }
0x1866   :  { %3964 = vmatprep.subr.mxu1 %v4112_v2 }
0x1867   :  { %3965 = vmatpush3.msra.mxu1 %v3033_v47 }
0x1868   :  { %3966 = vmatprep.subr.mxu1 %v4112_v2 }
0x1869   :  { %3967 = vmatpush3.msra.mxu1 %v3032_v51 }
0x186a   :  { %3993 = vmatprep.subr.mxu1 %v4112_v2 }
0x1921   :  { %v2942_v4 = vpop.f32.mrf.mxu0 }
0x1922   :  { %v2949_v21 = vadd.f32 %v2947_v20, %v2942_v4  ;;  %v3030_v7 = vadd.f32 %v3029_v1, %v2942_v4 }
0x1923   :  { %v3954_v8 = vpop.f32.mrf.mxu0 }
0x1924   :  { %2951 = vrot.lane.b32.xlu1 %v2949_v21, %s4114_s23 }
0x1996   :  { %v2952_v11 = vpop.permute.xlu1 %2951 }
0x1997   :  { %3958 = vmatmul.mubr.msk.f32.vlgmr.msra.gmra.mxu0 %vm742_vm7, %v2952_v11 }
0x1998   :  { %3972 = vmatpush3.msra.mxu0 %v3114_v58  ;;  %3975 = vmatprep.mubr.msk.f32.mxu0 %vm4113_vm1, %v4112_v2 }
0x1999   :  { %3973 = vmatprep.subr.mxu0 %v4112_v2 }
0x199a   :  { %3974 = vmatpush3.msra.mxu0 %v3113_v50 }
0x199b   :  { %3976 = vmatmul.mubr.msk.f32.vlgmr.msra.gmra.mxu0 %vm53_vm2, %v48_v12  ;;  %3978 = vmatprep.subr.mxu0 %v4112_v2 }
0x199c   :  { %3990 = vmatprep.mubr.msk.f32.mxu0 %vm4113_vm1, %v4112_v2  ;;  %3979 = vmatpush3.msra.mxu0 %v31_v13 }
0x199d   :  { %3980 = vmatprep.subr.mxu0 %v4112_v2 }
0x199e   :  { %3981 = vmatpush3.msra.mxu0 %v30_v14 }
0x199f   :  { %3982 = vmatprep.subr.mxu0 %v4112_v2 }
0x19a0   :  { %3983 = vmatpush3.msra.mxu0 %v29_v61 }
0x19a1   :  { %3984 = vmatprep.subr.mxu0 %v4112_v2 }
0x19a2   :  { %3985 = vmatpush3.msra.mxu0 %v28_v25 }
0x19a3   :  { %3986 = vmatprep.subr.mxu0 %v4112_v2 }
0x19a4   :  { %3987 = vmatpush3.msra.mxu0 %v27_v26 }
0x19a5   :  { %3988 = vmatprep.subr.mxu0 %v4112_v2 }
0x19a6   :  { %3989 = vmatpush3.msra.mxu0 %v26_v27 }
0x1a57   :  { %v3021_v36 = vpop.f32.mrf.mxu0 }
0x1a58   :  { %4099 = vrcp.f32 %v3021_v36 }
0x1a59   :  { %v3959_v15 = vpop.f32.mrf.mxu0 }
0x1a5b   :  { %v3184_v17 = vpop.f32.mrf.mxu0 }
0x1a5c   :  { %3189 = vrot.lane.b32.xlu1 %v3184_v17, %s4118_s11 }
0x1a5d   :  { %v3977_v22 = vpop.f32.mrf.mxu0 }
0x1a65   :  { %v4100_v23 = vpop.eup %4099 }
0x1a66   :  { %v3031_v24 = vmul.f32 %v4100_v23, %v3030_v7 }
0x1a68   :  { %3969 = vmatmul.mubr.msk.f32.vlgmr.msra.gmra.mxu1 %vm221_vm3, %v3031_v24 }
0x1a69   :  { %4017 = vmatprep.mubr.msk.f32.mxu1 %vm4113_vm1, %v4112_v2  ;;  %3994 = vmatpush3.msra.mxu1 %v43_v28  ;;  %vm3350_vm1 = vcmask 386048  }
0x1a6a   :  { %3995 = vmatprep.subr.mxu1 %v4112_v2 }
0x1a6b   :  { %3996 = vmatpush3.msra.mxu1 %v42_v30 }
0x1a6c   :  { %3997 = vmatprep.subr.mxu1 %v4112_v2 }
0x1a6d   :  { %3998 = vmatpush3.msra.mxu1 %v41_v3 }
0x1a6e   :  { %3999 = vmatprep.subr.mxu1 %v4112_v2 }
0x1a6f   :  { %4000 = vmatpush3.msra.mxu1 %v40_v31 }
0x1a70   :  { %4001 = vmatprep.subr.mxu1 %v4112_v2 }
0x1a71   :  { %4002 = vmatpush3.msra.mxu1 %v39_v29 }
0x1a72   :  { %4003 = vmatprep.subr.mxu1 %v4112_v2 }
0x1a73   :  { %4004 = vmatpush3.msra.mxu1 %v38_v32 }
0x1a74   :  { %4005 = vmatprep.subr.mxu1 %v4112_v2 }
0x1a75   :  { %4006 = vmatpush3.msra.mxu1 %v37_v33 }
0x1a76   :  { %4007 = vmatprep.subr.mxu1 %v4112_v2 }
0x1a77   :  { %4008 = vmatpush3.msra.mxu1 %v36_v35 }
0x1a78   :  { %4009 = vmatprep.subr.mxu1 %v4112_v2 }
0x1a79   :  { %4010 = vmatpush3.msra.mxu1 %v35_v37 }
0x1a7a   :  { %4011 = vmatprep.subr.mxu1 %v4112_v2 }
0x1a7b   :  { %4012 = vmatpush3.msra.mxu1 %v34_v43 }
0x1a7c   :  { %4013 = vmatprep.subr.mxu1 %v4112_v2 }
0x1a7d   :  { %4014 = vmatpush3.msra.mxu1 %v33_v44 }
0x1a7e   :  { %4015 = vmatprep.subr.mxu1 %v4112_v2 }
0x1a7f   :  { %4016 = vmatpush3.msra.mxu1 %v32_v59 }
0x1ace   :  { %v3190_v42 = vpop.permute.xlu1 %3189 }
0x1b28   :  { %v3106_v34 = vpop.f32.mrf.mxu1 }
0x1b29   :  { %v3107_v6 = vadd.f32 %v3106_v34, %v3036_v38 }
0x1b2a   :  { %v3970_v40 = vpop.f32.mrf.mxu1 }
0x1b2b   :  { %vm3110_vm14 = vcmp.ge.f32.partialorder %v3107_v6, 0.0  ;;  %v3111_v41 = vmul.f32 0.01, %v3107_v6 }
0x1b2d   :  { %v3112_v5 = vsel %vm3110_vm14, %v3107_v6, %v3111_v41 }
0x1b2e   :  { %v3192_v9 = vsel %vm132_vm0, %v3112_v5, %v3190_v42  ;;  %vm3276_vm0 = vcmask 785408  }
0x1b2f   :  { %3991 = vmatmul.mubr.msk.f32.vlgmr.msra.gmra.mxu0 %vm3197_vm15, %v3192_v9 }
0x1bef   :  { %v3267_v18 = vpop.f32.mrf.mxu0 }
0x1bf0   :  { %v3268_v45 = vadd.f32 %v3452_v16, %v3267_v18 }
0x1bf1   :  { %v3992_v46 = vpop.f32.mrf.mxu0 }
0x1bf2   :  { %v3271_v48 = vmax.f32 %v3268_v45, 0.0 }
0x1bf4   :  { %4018 = vmatmul.mubr.msk.f32.vlgmr.msra.gmra.mxu1 %vm3276_vm0, %v3271_v48 }
0x1cb4   :  { %v3346_v52 = vpop.f32.mrf.mxu1 }
0x1cb5   :  { %v3347_v53 = vadd.f32 %v3454_v49, %v3346_v52 }
0x1cb6   :  { %v4019_v54 = vpop.f32.mrf.mxu1 }
0x1cb7   :  { %3351 = vst.msk [vmem:[%s4913_s3] sm:$0x3] %vm3350_vm1, %v3347_v53 }

</bundles_post_ra>
